<compile_context>
chip_gen: v7x
topology: tpu7x:2x2x1
jax: 0.10.0
libtpu: 0.0.40
codegen_flags: <defaults>
</compile_context>

<pallas_src>
import jax
import jax.numpy as jnp
from jax import lax
from jax.experimental import pallas as pl
from jax.experimental.pallas import tpu as pltpu

EPS = 1e-5
LANES = 128  # channel tile = one full lane group


def _relu_dwconv_bn_kernel(x_ref, w_ref, gamma_ref, beta_ref, out_ref, ypad_ref):
    """Per-channel-tile kernel (one 128-lane channel block per grid step).

    x_ref:     (N, H, W, CT)      input tile (NHWC, CT = 128 channels)
    w_ref:     (3, 3, CT)         depthwise 3x3 filter taps for this tile
    gamma_ref: (1, CT)            BN scale
    beta_ref:  (1, CT)            BN shift
    out_ref:   (N, H, W, CT)      output tile
    ypad_ref:  (N, H+2, W+2, CT)  scratch: ReLU(x) with a 1-wide zero border
    """
    N, H, W, CT = x_ref.shape

    # --- ReLU + zero *border only* (no full-buffer zero-fill) ---
    zero_row = jnp.zeros((N, 1, W + 2, CT), jnp.float32)
    ypad_ref[:, 0:1, :, :] = zero_row
    ypad_ref[:, H + 1:H + 2, :, :] = zero_row
    zero_col = jnp.zeros((N, H + 2, 1, CT), jnp.float32)
    ypad_ref[:, :, 0:1, :] = zero_col
    ypad_ref[:, :, W + 1:W + 2, :] = zero_col
    ypad_ref[:, 1:H + 1, 1:W + 1, :] = jnp.maximum(x_ref[...], 0.0)

    # --- Depthwise 3x3 convolution, stride 1, pad 1 ---
    acc = jnp.zeros((N, H, W, CT), dtype=jnp.float32)
    for kh in range(3):
        for kw in range(3):
            tap = w_ref[kh, kw]                                # (CT,)
            acc = acc + ypad_ref[:, kh:kh + H, kw:kw + W, :] * tap

    # --- BatchNorm2d, training-mode forward, one-pass batch statistics ---
    cnt = float(N * H * W)
    s1 = jnp.sum(acc, axis=(0, 1, 2), keepdims=True)           # (1,1,1,CT)
    s2 = jnp.sum(acc * acc, axis=(0, 1, 2), keepdims=True)     # (1,1,1,CT)
    mean = s1 / cnt
    var = jnp.maximum(s2 / cnt - mean * mean, 0.0)              # biased variance
    inv_std = lax.rsqrt(var + EPS)
    scale = gamma_ref[0] * inv_std                              # (1,1,1,CT)
    shift = beta_ref[0] - mean * scale                          # (1,1,1,CT)
    out_ref[...] = (acc * scale + shift).astype(out_ref.dtype)


@jax.jit
def relu_dwconv_bn(x_nchw, w_dw, gamma, beta):
    """x_nchw: (N, C, H, W) f32; w_dw: (C, 1, 3, 3) f32 (PyTorch depthwise layout);
       gamma, beta: (C,) f32.  Returns (N, C, H, W) f32."""
    N, C, H, W = x_nchw.shape
    c_pad = ((C + LANES - 1) // LANES) * LANES

    # NCHW -> NHWC so channels sit on the lane axis; pad C to a multiple of 128.
    x_nhwc = jnp.transpose(x_nchw, (0, 2, 3, 1))                # (N, H, W, C)
    w_kkc = jnp.transpose(w_dw[:, 0, :, :], (1, 2, 0))          # (3, 3, C)
    if c_pad != C:
        pad = c_pad - C
        x_nhwc = jnp.pad(x_nhwc, ((0, 0), (0, 0), (0, 0), (0, pad)))
        w_kkc = jnp.pad(w_kkc, ((0, 0), (0, 0), (0, pad)))
        gamma = jnp.pad(gamma, (0, pad))
        beta = jnp.pad(beta, (0, pad))
    gamma2 = gamma.reshape(1, c_pad)
    beta2 = beta.reshape(1, c_pad)

    n_ctiles = c_pad // LANES

    out_nhwc = pl.pallas_call(
        _relu_dwconv_bn_kernel,
        out_shape=jax.ShapeDtypeStruct((N, H, W, c_pad), jnp.float32),
        grid=(n_ctiles,),
        in_specs=[
            pl.BlockSpec((N, H, W, LANES), lambda c: (0, 0, 0, c)),
            pl.BlockSpec((3, 3, LANES), lambda c: (0, 0, c)),
            pl.BlockSpec((1, LANES), lambda c: (0, c)),
            pl.BlockSpec((1, LANES), lambda c: (0, c)),
        ],
        out_specs=pl.BlockSpec((N, H, W, LANES), lambda c: (0, 0, 0, c)),
        scratch_shapes=[pltpu.VMEM((N, H + 2, W + 2, LANES), jnp.float32)],
        compiler_params=pltpu.CompilerParams(
            dimension_semantics=("parallel",),
            vmem_limit_bytes=32 * 1024 * 1024,
        ),
    )(x_nhwc, w_kkc, gamma2, beta2)

    out_nhwc = out_nhwc[..., :C]
    return jnp.transpose(out_nhwc, (0, 3, 1, 2))                # back to NCHW


def _reference(x_nchw, w_dw, gamma, beta):
    """Pure-JAX reference (lax depthwise conv + training-mode BN) in NCHW."""
    N, C, H, W = x_nchw.shape
    y = jnp.maximum(x_nchw, 0.0)
    conv = lax.conv_general_dilated(
        y, w_dw,
        window_strides=(1, 1),
        padding=((1, 1), (1, 1)),
        dimension_numbers=("NCHW", "OIHW", "NCHW"),
        feature_group_count=C,
    )
    mean = jnp.mean(conv, axis=(0, 2, 3), keepdims=True)
    var = jnp.mean((conv - mean) ** 2, axis=(0, 2, 3), keepdims=True)
    g = gamma.reshape(1, C, 1, 1)
    b = beta.reshape(1, C, 1, 1)
    return (conv - mean) * lax.rsqrt(var + EPS) * g + b


if __name__ == "__main__":
    # Exact shapes implied by the PyTorch module: (1, 432, 14, 14), 432 channels.
    N, C, H, W = 1, 432, 14, 14

    key = jax.random.PRNGKey(0)
    kx, kw, kg, kb = jax.random.split(key, 4)
    x = jax.random.normal(kx, (N, C, H, W), dtype=jnp.float32)
    w_dw = jax.random.normal(kw, (C, 1, 3, 3), dtype=jnp.float32) * 0.1
    gamma = 1.0 + 0.1 * jax.random.normal(kg, (C,), dtype=jnp.float32)
    beta = 0.1 * jax.random.normal(kb, (C,), dtype=jnp.float32)

    out = jax.block_until_ready(relu_dwconv_bn(x, w_dw, gamma, beta))
    ref = jax.block_until_ready(_reference(x, w_dw, gamma, beta))

    assert out.shape == (N, C, H, W)
    assert jnp.allclose(out, ref, atol=2e-4, rtol=2e-4), "mismatch vs reference"

    print("KERNEL_OK")
</pallas_src>

<mosaic_0001>
module attributes {stable_mosaic.version = 11 : i64} {
  func.func @_relu_dwconv_bn_kernel(%arg0: i32, %arg1: memref<1x14x14x128xf32, #tpu.memory_space<vmem>>, %arg2: memref<3x3x128xf32, #tpu.memory_space<vmem>>, %arg3: memref<1x128xf32, #tpu.memory_space<vmem>>, %arg4: memref<1x128xf32, #tpu.memory_space<vmem>>, %arg5: memref<1x14x14x128xf32, #tpu.memory_space<vmem>>, %arg6: memref<1x16x16x128xf32, #tpu.memory_space<vmem>>) attributes {dimension_semantics = [#tpu.dimension_semantics<parallel>], iteration_bounds = array<i64: 4>, scalar_prefetch = 0 : i64, scratch_operands = 1 : i64, tpu.core_type = #tpu.core_type<tc>, window_params = [{transform_indices = @transform_0, window_bounds = array<i64: 1, 14, 14, 128>}, {transform_indices = @transform_1, window_bounds = array<i64: 3, 3, 128>}, {transform_indices = @transform_2, window_bounds = array<i64: 1, 128>}, {transform_indices = @transform_3, window_bounds = array<i64: 1, 128>}, {transform_indices = @transform_4, window_bounds = array<i64: 1, 14, 14, 128>}]} {
    %cst = arith.constant 0.000000e+00 : f32
    %0 = vector.broadcast %cst : f32 to vector<1x1x16x128xf32>
    %c0 = arith.constant 0 : index
    %c0_0 = arith.constant 0 : index
    %c0_1 = arith.constant 0 : index
    %c0_2 = arith.constant 0 : index
    %1 = vector.load %arg6[%c0, %c0_0, %c0_1, %c0_2] : memref<1x16x16x128xf32, #tpu.memory_space<vmem>>, vector<1x1x16x128xf32>
    tpu.vector_store %arg6[%c0, %c0_0, %c0_1, %c0_2], %0 {strides = array<i32>} : memref<1x16x16x128xf32, #tpu.memory_space<vmem>>, vector<1x1x16x128xf32>,
    %c0_3 = arith.constant 0 : index
    %c15 = arith.constant 15 : index
    %c0_4 = arith.constant 0 : index
    %c0_5 = arith.constant 0 : index
    %2 = vector.load %arg6[%c0_3, %c15, %c0_4, %c0_5] : memref<1x16x16x128xf32, #tpu.memory_space<vmem>>, vector<1x1x16x128xf32>
    tpu.vector_store %arg6[%c0_3, %c15, %c0_4, %c0_5], %0 {strides = array<i32>} : memref<1x16x16x128xf32, #tpu.memory_space<vmem>>, vector<1x1x16x128xf32>,
    %cst_6 = arith.constant 0.000000e+00 : f32
    %3 = vector.broadcast %cst_6 : f32 to vector<1x16x1x128xf32>
    %c0_7 = arith.constant 0 : index
    %c0_8 = arith.constant 0 : index
    %c0_9 = arith.constant 0 : index
    %c0_10 = arith.constant 0 : index
    %4 = vector.load %arg6[%c0_7, %c0_8, %c0_9, %c0_10] : memref<1x16x16x128xf32, #tpu.memory_space<vmem>>, vector<1x16x1x128xf32>
    tpu.vector_store %arg6[%c0_7, %c0_8, %c0_9, %c0_10], %3 {strides = array<i32>} : memref<1x16x16x128xf32, #tpu.memory_space<vmem>>, vector<1x16x1x128xf32>,
    %c0_11 = arith.constant 0 : index
    %c0_12 = arith.constant 0 : index
    %c15_13 = arith.constant 15 : index
    %c0_14 = arith.constant 0 : index
    %5 = vector.load %arg6[%c0_11, %c0_12, %c15_13, %c0_14] : memref<1x16x16x128xf32, #tpu.memory_space<vmem>>, vector<1x16x1x128xf32>
    tpu.vector_store %arg6[%c0_11, %c0_12, %c15_13, %c0_14], %3 {strides = array<i32>} : memref<1x16x16x128xf32, #tpu.memory_space<vmem>>, vector<1x16x1x128xf32>,
    %c0_15 = arith.constant 0 : index
    %c0_16 = arith.constant 0 : index
    %c0_17 = arith.constant 0 : index
    %c0_18 = arith.constant 0 : index
    %6 = vector.load %arg1[%c0_15, %c0_16, %c0_17, %c0_18] : memref<1x14x14x128xf32, #tpu.memory_space<vmem>>, vector<1x14x14x128xf32>
    %cst_19 = arith.constant 0.000000e+00 : f32
    %7 = vector.broadcast %cst_19 : f32 to vector<1x14x14x128xf32>
    %8 = arith.maximumf %6, %7 : vector<1x14x14x128xf32>
    %c0_20 = arith.constant 0 : index
    %c1 = arith.constant 1 : index
    %c1_21 = arith.constant 1 : index
    %c0_22 = arith.constant 0 : index
    %9 = vector.load %arg6[%c0_20, %c1, %c1_21, %c0_22] : memref<1x16x16x128xf32, #tpu.memory_space<vmem>>, vector<1x14x14x128xf32>
    tpu.vector_store %arg6[%c0_20, %c1, %c1_21, %c0_22], %8 {strides = array<i32>} : memref<1x16x16x128xf32, #tpu.memory_space<vmem>>, vector<1x14x14x128xf32>,
    %cst_23 = arith.constant 0.000000e+00 : f32
    %10 = vector.broadcast %cst_23 : f32 to vector<1x14x14x128xf32>
    %c0_24 = arith.constant 0 : index
    %c0_25 = arith.constant 0 : index
    %c0_26 = arith.constant 0 : index
    %11 = vector.load %arg2[%c0_24, %c0_25, %c0_26] : memref<3x3x128xf32, #tpu.memory_space<vmem>>, vector<1x1x128xf32>
    %12 = vector.shape_cast %11 : vector<1x1x128xf32> to vector<128xf32>
    %c0_27 = arith.constant 0 : index
    %c0_28 = arith.constant 0 : index
    %c0_29 = arith.constant 0 : index
    %c0_30 = arith.constant 0 : index
    %13 = vector.load %arg6[%c0_27, %c0_28, %c0_29, %c0_30] : memref<1x16x16x128xf32, #tpu.memory_space<vmem>>, vector<1x14x14x128xf32>
    %14 = vector.shape_cast %12 : vector<128xf32> to vector<1x1x1x128xf32>
    %15 = vector.broadcast %14 : vector<1x1x1x128xf32> to vector<1x14x14x128xf32>
    %16 = arith.mulf %13, %15 : vector<1x14x14x128xf32>
    %17 = arith.addf %10, %16 : vector<1x14x14x128xf32>
    %c0_31 = arith.constant 0 : index
    %c1_32 = arith.constant 1 : index
    %c0_33 = arith.constant 0 : index
    %18 = vector.load %arg2[%c0_31, %c1_32, %c0_33] : memref<3x3x128xf32, #tpu.memory_space<vmem>>, vector<1x1x128xf32>
    %19 = vector.shape_cast %18 : vector<1x1x128xf32> to vector<128xf32>
    %c0_34 = arith.constant 0 : index
    %c0_35 = arith.constant 0 : index
    %c1_36 = arith.constant 1 : index
    %c0_37 = arith.constant 0 : index
    %20 = vector.load %arg6[%c0_34, %c0_35, %c1_36, %c0_37] : memref<1x16x16x128xf32, #tpu.memory_space<vmem>>, vector<1x14x14x128xf32>
    %21 = vector.shape_cast %19 : vector<128xf32> to vector<1x1x1x128xf32>
    %22 = vector.broadcast %21 : vector<1x1x1x128xf32> to vector<1x14x14x128xf32>
    %23 = arith.mulf %20, %22 : vector<1x14x14x128xf32>
    %24 = arith.addf %17, %23 : vector<1x14x14x128xf32>
    %c0_38 = arith.constant 0 : index
    %c2 = arith.constant 2 : index
    %c0_39 = arith.constant 0 : index
    %25 = vector.load %arg2[%c0_38, %c2, %c0_39] : memref<3x3x128xf32, #tpu.memory_space<vmem>>, vector<1x1x128xf32>
    %26 = vector.shape_cast %25 : vector<1x1x128xf32> to vector<128xf32>
    %c0_40 = arith.constant 0 : index
    %c0_41 = arith.constant 0 : index
    %c2_42 = arith.constant 2 : index
    %c0_43 = arith.constant 0 : index
    %27 = vector.load %arg6[%c0_40, %c0_41, %c2_42, %c0_43] : memref<1x16x16x128xf32, #tpu.memory_space<vmem>>, vector<1x14x14x128xf32>
    %28 = vector.shape_cast %26 : vector<128xf32> to vector<1x1x1x128xf32>
    %29 = vector.broadcast %28 : vector<1x1x1x128xf32> to vector<1x14x14x128xf32>
    %30 = arith.mulf %27, %29 : vector<1x14x14x128xf32>
    %31 = arith.addf %24, %30 : vector<1x14x14x128xf32>
    %c1_44 = arith.constant 1 : index
    %c0_45 = arith.constant 0 : index
    %c0_46 = arith.constant 0 : index
    %32 = vector.load %arg2[%c1_44, %c0_45, %c0_46] : memref<3x3x128xf32, #tpu.memory_space<vmem>>, vector<1x1x128xf32>
    %33 = vector.shape_cast %32 : vector<1x1x128xf32> to vector<128xf32>
    %c0_47 = arith.constant 0 : index
    %c1_48 = arith.constant 1 : index
    %c0_49 = arith.constant 0 : index
    %c0_50 = arith.constant 0 : index
    %34 = vector.load %arg6[%c0_47, %c1_48, %c0_49, %c0_50] : memref<1x16x16x128xf32, #tpu.memory_space<vmem>>, vector<1x14x14x128xf32>
    %35 = vector.shape_cast %33 : vector<128xf32> to vector<1x1x1x128xf32>
    %36 = vector.broadcast %35 : vector<1x1x1x128xf32> to vector<1x14x14x128xf32>
    %37 = arith.mulf %34, %36 : vector<1x14x14x128xf32>
    %38 = arith.addf %31, %37 : vector<1x14x14x128xf32>
    %c1_51 = arith.constant 1 : index
    %c1_52 = arith.constant 1 : index
    %c0_53 = arith.constant 0 : index
    %39 = vector.load %arg2[%c1_51, %c1_52, %c0_53] : memref<3x3x128xf32, #tpu.memory_space<vmem>>, vector<1x1x128xf32>
    %40 = vector.shape_cast %39 : vector<1x1x128xf32> to vector<128xf32>
    %c0_54 = arith.constant 0 : index
    %c1_55 = arith.constant 1 : index
    %c1_56 = arith.constant 1 : index
    %c0_57 = arith.constant 0 : index
    %41 = vector.load %arg6[%c0_54, %c1_55, %c1_56, %c0_57] : memref<1x16x16x128xf32, #tpu.memory_space<vmem>>, vector<1x14x14x128xf32>
    %42 = vector.shape_cast %40 : vector<128xf32> to vector<1x1x1x128xf32>
    %43 = vector.broadcast %42 : vector<1x1x1x128xf32> to vector<1x14x14x128xf32>
    %44 = arith.mulf %41, %43 : vector<1x14x14x128xf32>
    %45 = arith.addf %38, %44 : vector<1x14x14x128xf32>
    %c1_58 = arith.constant 1 : index
    %c2_59 = arith.constant 2 : index
    %c0_60 = arith.constant 0 : index
    %46 = vector.load %arg2[%c1_58, %c2_59, %c0_60] : memref<3x3x128xf32, #tpu.memory_space<vmem>>, vector<1x1x128xf32>
    %47 = vector.shape_cast %46 : vector<1x1x128xf32> to vector<128xf32>
    %c0_61 = arith.constant 0 : index
    %c1_62 = arith.constant 1 : index
    %c2_63 = arith.constant 2 : index
    %c0_64 = arith.constant 0 : index
    %48 = vector.load %arg6[%c0_61, %c1_62, %c2_63, %c0_64] : memref<1x16x16x128xf32, #tpu.memory_space<vmem>>, vector<1x14x14x128xf32>
    %49 = vector.shape_cast %47 : vector<128xf32> to vector<1x1x1x128xf32>
    %50 = vector.broadcast %49 : vector<1x1x1x128xf32> to vector<1x14x14x128xf32>
    %51 = arith.mulf %48, %50 : vector<1x14x14x128xf32>
    %52 = arith.addf %45, %51 : vector<1x14x14x128xf32>
    %c2_65 = arith.constant 2 : index
    %c0_66 = arith.constant 0 : index
    %c0_67 = arith.constant 0 : index
    %53 = vector.load %arg2[%c2_65, %c0_66, %c0_67] : memref<3x3x128xf32, #tpu.memory_space<vmem>>, vector<1x1x128xf32>
    %54 = vector.shape_cast %53 : vector<1x1x128xf32> to vector<128xf32>
    %c0_68 = arith.constant 0 : index
    %c2_69 = arith.constant 2 : index
    %c0_70 = arith.constant 0 : index
    %c0_71 = arith.constant 0 : index
    %55 = vector.load %arg6[%c0_68, %c2_69, %c0_70, %c0_71] : memref<1x16x16x128xf32, #tpu.memory_space<vmem>>, vector<1x14x14x128xf32>
    %56 = vector.shape_cast %54 : vector<128xf32> to vector<1x1x1x128xf32>
    %57 = vector.broadcast %56 : vector<1x1x1x128xf32> to vector<1x14x14x128xf32>
    %58 = arith.mulf %55, %57 : vector<1x14x14x128xf32>
    %59 = arith.addf %52, %58 : vector<1x14x14x128xf32>
    %c2_72 = arith.constant 2 : index
    %c1_73 = arith.constant 1 : index
    %c0_74 = arith.constant 0 : index
    %60 = vector.load %arg2[%c2_72, %c1_73, %c0_74] : memref<3x3x128xf32, #tpu.memory_space<vmem>>, vector<1x1x128xf32>
    %61 = vector.shape_cast %60 : vector<1x1x128xf32> to vector<128xf32>
    %c0_75 = arith.constant 0 : index
    %c2_76 = arith.constant 2 : index
    %c1_77 = arith.constant 1 : index
    %c0_78 = arith.constant 0 : index
    %62 = vector.load %arg6[%c0_75, %c2_76, %c1_77, %c0_78] : memref<1x16x16x128xf32, #tpu.memory_space<vmem>>, vector<1x14x14x128xf32>
    %63 = vector.shape_cast %61 : vector<128xf32> to vector<1x1x1x128xf32>
    %64 = vector.broadcast %63 : vector<1x1x1x128xf32> to vector<1x14x14x128xf32>
    %65 = arith.mulf %62, %64 : vector<1x14x14x128xf32>
    %66 = arith.addf %59, %65 : vector<1x14x14x128xf32>
    %c2_79 = arith.constant 2 : index
    %c2_80 = arith.constant 2 : index
    %c0_81 = arith.constant 0 : index
    %67 = vector.load %arg2[%c2_79, %c2_80, %c0_81] : memref<3x3x128xf32, #tpu.memory_space<vmem>>, vector<1x1x128xf32>
    %68 = vector.shape_cast %67 : vector<1x1x128xf32> to vector<128xf32>
    %c0_82 = arith.constant 0 : index
    %c2_83 = arith.constant 2 : index
    %c2_84 = arith.constant 2 : index
    %c0_85 = arith.constant 0 : index
    %69 = vector.load %arg6[%c0_82, %c2_83, %c2_84, %c0_85] : memref<1x16x16x128xf32, #tpu.memory_space<vmem>>, vector<1x14x14x128xf32>
    %70 = vector.shape_cast %68 : vector<128xf32> to vector<1x1x1x128xf32>
    %71 = vector.broadcast %70 : vector<1x1x1x128xf32> to vector<1x14x14x128xf32>
    %72 = arith.mulf %69, %71 : vector<1x14x14x128xf32>
    %73 = arith.addf %66, %72 : vector<1x14x14x128xf32>
    %cst_86 = arith.constant dense<0.000000e+00> : vector<128xf32>
    %74 = vector.multi_reduction <add>, %73, %cst_86 [0, 1, 2] : vector<1x14x14x128xf32> to vector<128xf32>
    %75 = vector.shape_cast %74 : vector<128xf32> to vector<1x1x1x128xf32>
    %76 = arith.mulf %73, %73 : vector<1x14x14x128xf32>
    %cst_87 = arith.constant dense<0.000000e+00> : vector<128xf32>
    %77 = vector.multi_reduction <add>, %76, %cst_87 [0, 1, 2] : vector<1x14x14x128xf32> to vector<128xf32>
    %78 = vector.shape_cast %77 : vector<128xf32> to vector<1x1x1x128xf32>
    %cst_88 = arith.constant 1.960000e+02 : f32
    %79 = vector.broadcast %cst_88 : f32 to vector<1x1x1x128xf32>
    %80 = arith.divf %75, %79 : vector<1x1x1x128xf32>
    %cst_89 = arith.constant 1.960000e+02 : f32
    %81 = vector.broadcast %cst_89 : f32 to vector<1x1x1x128xf32>
    %82 = arith.divf %78, %81 : vector<1x1x1x128xf32>
    %83 = arith.mulf %80, %80 : vector<1x1x1x128xf32>
    %84 = arith.subf %82, %83 : vector<1x1x1x128xf32>
    %cst_90 = arith.constant 0.000000e+00 : f32
    %85 = vector.broadcast %cst_90 : f32 to vector<1x1x1x128xf32>
    %86 = arith.maximumf %84, %85 : vector<1x1x1x128xf32>
    %cst_91 = arith.constant 9.99999974E-6 : f32
    %87 = vector.broadcast %cst_91 : f32 to vector<1x1x1x128xf32>
    %88 = arith.addf %86, %87 : vector<1x1x1x128xf32>
    %89 = math.rsqrt %88 : vector<1x1x1x128xf32>
    %c0_92 = arith.constant 0 : index
    %c0_93 = arith.constant 0 : index
    %90 = vector.load %arg3[%c0_92, %c0_93] : memref<1x128xf32, #tpu.memory_space<vmem>>, vector<1x128xf32>
    %91 = vector.shape_cast %90 : vector<1x128xf32> to vector<128xf32>
    %92 = vector.shape_cast %91 : vector<128xf32> to vector<1x1x1x128xf32>
    %93 = arith.mulf %92, %89 : vector<1x1x1x128xf32>
    %c0_94 = arith.constant 0 : index
    %c0_95 = arith.constant 0 : index
    %94 = vector.load %arg4[%c0_94, %c0_95] : memref<1x128xf32, #tpu.memory_space<vmem>>, vector<1x128xf32>
    %95 = vector.shape_cast %94 : vector<1x128xf32> to vector<128xf32>
    %96 = arith.mulf %80, %93 : vector<1x1x1x128xf32>
    %97 = vector.shape_cast %95 : vector<128xf32> to vector<1x1x1x128xf32>
    %98 = arith.subf %97, %96 : vector<1x1x1x128xf32>
    %99 = vector.broadcast %93 : vector<1x1x1x128xf32> to vector<1x14x14x128xf32>
    %100 = arith.mulf %73, %99 : vector<1x14x14x128xf32>
    %101 = vector.broadcast %98 : vector<1x1x1x128xf32> to vector<1x14x14x128xf32>
    %102 = arith.addf %100, %101 : vector<1x14x14x128xf32>
    %c0_96 = arith.constant 0 : index
    %c0_97 = arith.constant 0 : index
    %c0_98 = arith.constant 0 : index
    %c0_99 = arith.constant 0 : index
    %103 = vector.load %arg5[%c0_96, %c0_97, %c0_98, %c0_99] : memref<1x14x14x128xf32, #tpu.memory_space<vmem>>, vector<1x14x14x128xf32>
    tpu.vector_store %arg5[%c0_96, %c0_97, %c0_98, %c0_99], %102 {strides = array<i32>} : memref<1x14x14x128xf32, #tpu.memory_space<vmem>>, vector<1x14x14x128xf32>,
    return
  }
  func.func @transform_0(%arg0: i32) -> (i32, i32, i32, i32) {
    %c0_i32 = arith.constant 0 : i32
    %c0_i32_0 = arith.constant 0 : i32
    %c0_i32_1 = arith.constant 0 : i32
    %c0_i32_2 = arith.constant 0 : i32
    return %c0_i32, %c0_i32_0, %c0_i32_1, %arg0 : i32, i32, i32, i32
  }
  func.func @transform_1(%arg0: i32) -> (i32, i32, i32) {
    %c0_i32 = arith.constant 0 : i32
    %c0_i32_0 = arith.constant 0 : i32
    %c0_i32_1 = arith.constant 0 : i32
    return %c0_i32, %c0_i32_0, %arg0 : i32, i32, i32
  }
  func.func @transform_2(%arg0: i32) -> (i32, i32) {
    %c0_i32 = arith.constant 0 : i32
    %c0_i32_0 = arith.constant 0 : i32
    return %c0_i32, %arg0 : i32, i32
  }
  func.func @transform_3(%arg0: i32) -> (i32, i32) {
    %c0_i32 = arith.constant 0 : i32
    %c0_i32_0 = arith.constant 0 : i32
    return %c0_i32, %arg0 : i32, i32
  }
  func.func @transform_4(%arg0: i32) -> (i32, i32, i32, i32) {
    %c0_i32 = arith.constant 0 : i32
    %c0_i32_0 = arith.constant 0 : i32
    %c0_i32_1 = arith.constant 0 : i32
    %c0_i32_2 = arith.constant 0 : i32
    return %c0_i32, %c0_i32_0, %c0_i32_1, %arg0 : i32, i32, i32, i32
  }
}

</mosaic_0001>

<bundles_post_ra>
// kernel: relu_dwconv_bn.1
= control target key start
LH: loop header
LB: loop body
LE: loop exit
PB: predicated region body
PF: predicated region fallthrough
CT: control target
= control target key end

     0   :  { %s1946_s15 = smov 0   ;;  %s1948_s16 = smov 0   ;;  %s3032_s0 = inlined_call_operand.vmem [shape: f32[1,14,14,512], index: 0, kind: input, shape index: {}]   ;;  %s3033_s1 = inlined_call_operand.vmem [shape: f32[3,3,512], index: 1, kind: input, shape index: {}]   ;;  %s3034_s2 = inlined_call_operand.vmem [shape: f32[1,512], index: 2, kind: input, shape index: {}]   ;;  %s3035_s3 = inlined_call_operand.vmem [shape: f32[1,512], index: 3, kind: input, shape index: {}]   ;;  %s3036_s4 = inlined_call_operand.vmem [shape: f32[1,14,14,512], index: 4, kind: output, shape index: {}]  }
   0x1   :  { %s1950_s17 = smov 0  }
   0x2 LB: > { %s1962_s18 = sadd.s32 4294967295, %s1918_s17   ;;  %s1965_s19 = sadd.s32 1, %s1918_s17   ;;  %s1918_s17 = sphi %s1950_s17, %s3084_s17   ;;  %s1914_s16 = sphi %s1948_s16, %s3083_s16   ;;  %s1910_s15 = sphi %s1946_s15, %s3082_s15  }
   0x3   : > { %s18_s20 = ssub.s32 %s1918_s17, %s1965_s19  ;;  %s21_s21 = sadd.s32 1, %s1914_s16 }
   0x4   : > { %p19_p0 = scmp.eq.s32.totalorder %s18_s20, 0  ;;  %p28_p1 = scmp.ne.s32.totalorder %s1914_s16, %s1910_s15 }
   0x5   : > { %p29_p2 = scmp.eq.s32.totalorder %s1918_s17, 0  ;;  %p136_p3 = scmp.eq.s32.totalorder %s1962_s18, 3 }
   0x6   : > { %s1975_s22 = scalar_select %p19_p0, %s1914_s16, %s21_s21  }
   0x7   : > { %p1977_p4 = por %p29_p2, %p28_p1  ;;  %p1981_p5 = por %p136_p3, %p28_p1 }
   0x8   : > { %p1833_p6 = scmp.ge.s32.totalorder %s1918_s17, 4 }
   0xa   : > { %158 = sbr.rel (%p1833_p6) target bundleno = 56 (0x38), region = 16 }
  0x11   : > { %161 = sbr.rel (!%p1977_p4) target bundleno = 49 (0x31), region = 20  ;;  %s163_s25 = sand.u32 (%p1977_p4), 1, %s1914_s16  }
  0x12   : > { %s1834_s26 = sshll.u32 (%p1977_p4), %s1918_s17, 3  ;;  %s1855_s27 = smul.u32 (%p1977_p4), 224, %s163_s25 }
  0x13   : > { %s1993_s30 = scalar_lea.vmem (%p1977_p4), %s3032_s0, %s1834_s26 }
  0x14   : > { %v249_v0 = vld [vmem:[%s1993_s30] sm:$0xff] (%p1977_p4)  ;;  %s2001_s5 = scalar_lea.vmem (%p1977_p4), [#allocation3], %s1855_s27 }
  0x15   : > { %v251_v1 = vld [vmem:[%s1993_s30 + $0x20] sm:$0xff] (%p1977_p4)  ;;  %250 = vst [vmem:[%s2001_s5] sm:$0xff] (%p1977_p4), %v249_v0 }
  0x16   : > { %v253_v2 = vld [vmem:[%s1993_s30 + $0x40] sm:$0xff] (%p1977_p4)  ;;  %252 = vst [vmem:[%s2001_s5 + $0x8] sm:$0xff] (%p1977_p4), %v251_v1 }
  0x17   : > { %v255_v3 = vld [vmem:[%s1993_s30 + $0x60] sm:$0xff] (%p1977_p4)  ;;  %254 = vst [vmem:[%s2001_s5 + $0x10] sm:$0xff] (%p1977_p4), %v253_v2 }
  0x18   : > { %v257_v4 = vld [vmem:[%s1993_s30 + $0x80] sm:$0xff]  ;;  %256 = vst [vmem:[%s2001_s5 + $0x18] sm:$0xff] %v255_v3 }
  0x19   : > { %v259_v5 = vld [vmem:[%s1993_s30 + $0xa0] sm:$0xff]  ;;  %258 = vst [vmem:[%s2001_s5 + $0x20] sm:$0xff] %v257_v4 }
  0x1a   : > { %260 = vst [vmem:[%s2001_s5 + $0x28] sm:$0xff] %v259_v5  ;;  %v261_v6 = vld [vmem:[%s1993_s30 + $0xc0] sm:$0xff] }
  0x1b   : > { %v263_v7 = vld [vmem:[%s1993_s30 + $0xe0] sm:$0xff]  ;;  %262 = vst [vmem:[%s2001_s5 + $0x30] sm:$0xff] %v261_v6 }
  0x1c   : > { %v265_v8 = vld [vmem:[%s1993_s30 + $0x100] sm:$0xff]  ;;  %264 = vst [vmem:[%s2001_s5 + $0x38] sm:$0xff] %v263_v7 }
  0x1d   : > { %266 = vst [vmem:[%s2001_s5 + $0x40] sm:$0xff] %v265_v8  ;;  %v267_v9 = vld [vmem:[%s1993_s30 + $0x120] sm:$0xff] }
  0x1e   : > { %v269_v10 = vld [vmem:[%s1993_s30 + $0x140] sm:$0xff]  ;;  %268 = vst [vmem:[%s2001_s5 + $0x48] sm:$0xff] %v267_v9 }
  0x1f   : > { %v271_v11 = vld [vmem:[%s1993_s30 + $0x160] sm:$0xff]  ;;  %270 = vst [vmem:[%s2001_s5 + $0x50] sm:$0xff] %v269_v10 }
  0x20   : > { %272 = vst [vmem:[%s2001_s5 + $0x58] sm:$0xff] %v271_v11  ;;  %v273_v12 = vld [vmem:[%s1993_s30 + $0x180] sm:$0xff] }
  0x21   : > { %v275_v13 = vld [vmem:[%s1993_s30 + $0x1a0] sm:$0xff]  ;;  %274 = vst [vmem:[%s2001_s5 + $0x60] sm:$0xff] %v273_v12 }
  0x22   : > { %v277_v14 = vld [vmem:[%s1993_s30 + $0x1c0] sm:$0xff]  ;;  %276 = vst [vmem:[%s2001_s5 + $0x68] sm:$0xff] %v275_v13 }
  0x23   : > { %278 = vst [vmem:[%s2001_s5 + $0x70] sm:$0xff] %v277_v14  ;;  %v279_v15 = vld [vmem:[%s1993_s30 + $0x1e0] sm:$0xff] }
  0x24   : > { %v281_v16 = vld [vmem:[%s1993_s30 + $0x200] sm:$0xff]  ;;  %280 = vst [vmem:[%s2001_s5 + $0x78] sm:$0xff] %v279_v15 }
  0x25   : > { %v283_v17 = vld [vmem:[%s1993_s30 + $0x220] sm:$0xff]  ;;  %282 = vst [vmem:[%s2001_s5 + $0x80] sm:$0xff] %v281_v16 }
  0x26   : > { %284 = vst [vmem:[%s2001_s5 + $0x88] sm:$0xff] %v283_v17  ;;  %v285_v18 = vld [vmem:[%s1993_s30 + $0x240] sm:$0xff] }
  0x27   : > { %v287_v19 = vld [vmem:[%s1993_s30 + $0x260] sm:$0xff]  ;;  %286 = vst [vmem:[%s2001_s5 + $0x90] sm:$0xff] %v285_v18 }
  0x28   : > { %v289_v20 = vld [vmem:[%s1993_s30 + $0x280] sm:$0xff]  ;;  %288 = vst [vmem:[%s2001_s5 + $0x98] sm:$0xff] %v287_v19 }
  0x29   : > { %290 = vst [vmem:[%s2001_s5 + $0xa0] sm:$0xff] %v289_v20  ;;  %v291_v21 = vld [vmem:[%s1993_s30 + $0x2a0] sm:$0xff] }
  0x2a   : > { %v293_v22 = vld [vmem:[%s1993_s30 + $0x2c0] sm:$0xff]  ;;  %292 = vst [vmem:[%s2001_s5 + $0xa8] sm:$0xff] %v291_v21 }
  0x2b   : > { %v295_v23 = vld [vmem:[%s1993_s30 + $0x2e0] sm:$0xff]  ;;  %294 = vst [vmem:[%s2001_s5 + $0xb0] sm:$0xff] %v293_v22 }
  0x2c   : > { %296 = vst [vmem:[%s2001_s5 + $0xb8] sm:$0xff] %v295_v23  ;;  %v297_v24 = vld [vmem:[%s1993_s30 + $0x300] sm:$0xff] }
  0x2d   : > { %v299_v25 = vld [vmem:[%s1993_s30 + $0x320] sm:$0xff]  ;;  %298 = vst [vmem:[%s2001_s5 + $0xc0] sm:$0xff] %v297_v24 }
  0x2e   : > { %v301_v26 = vld [vmem:[%s1993_s30 + $0x340] sm:$0xff]  ;;  %300 = vst [vmem:[%s2001_s5 + $0xc8] sm:$0xff] %v299_v25 }
  0x2f   : > { %302 = vst [vmem:[%s2001_s5 + $0xd0] sm:$0xff] %v301_v26  ;;  %v303_v27 = vld [vmem:[%s1993_s30 + $0x360] sm:$0xff] }
  0x30   : > { %304 = vst [vmem:[%s2001_s5 + $0xd8] sm:$0xff] %v303_v27 }
  0x31 PF: > { %310 = sbr.rel (!%p1977_p4) target bundleno = 56 (0x38), region = 58  ;;  %s312_s6 = sand.u32 (%p1977_p4), 1, %s1914_s16  }
  0x32   : > { %s1835_s7 = sshll.u32 (%p1977_p4), %s1918_s17, 2  ;;  %s1856_s8 = smul.u32 (%p1977_p4), 12, %s312_s6 }
  0x33   : > { %s316_s11 = scalar_lea.vmem (%p1977_p4), %s3033_s1, %s1835_s7 }
  0x34   : > { %v332_v28 = vld [vmem:[%s316_s11] sm:$0xf] (%p1977_p4)  ;;  %v334_v29 = vld [vmem:[%s316_s11 + $0x10] sm:$0xf] (%p1977_p4)  ;;  %s314_s12 = scalar_lea.vmem (%p1977_p4), [#allocation4], %s1856_s8 }
  0x35   : > { %v336_v30 = vld [vmem:[%s316_s11 + $0x20] sm:$0xf] (%p1977_p4)  ;;  %333 = vst [vmem:[%s314_s12] sm:$0xf] (%p1977_p4), %v332_v28  ;;  %335 = vst [vmem:[%s314_s12 + $0x4] sm:$0xf] (%p1977_p4), %v334_v29 }
  0x36   : > { %337 = vst [vmem:[%s314_s12 + $0x8] sm:$0xf] (%p1977_p4), %v336_v30 }
  0x38 PF: > { %p1836_p7 = scmp.ge.s32.totalorder %s1918_s17, 1  ;;  %p377_p8 = scmp.lt.s32.totalorder %s1918_s17, 5 }
  0x3a   : > { %p378_p9 = pnand %p1836_p7, %p377_p8 }
  0x3c   : > { %381 = sbr.rel (%p378_p9) target bundleno = 323 (0x143), region = 107 }
  0x43   : > { %s384_s13 = sand.u32 1, %s1910_s15   ;;  %v1920_v31 = vmov 0.0   ;;  %vm1357_vm0 = vcmask 1045504   ;;  %p425_p10 = scmp.lt.s32.totalorder %s1962_s18, 3 }
  0x44   : > { %431 = vst [vmem:[#allocation2] sm:$0xff] %v1920_v31  ;;  %432 = vst [vmem:[#allocation2 + $0x8] sm:$0xff] %v1920_v31  ;;  %s1858_s14 = smul.u32 12, %s384_s13  ;;  %s1852_s5 = sshll.u32 (%p1981_p5), %s1962_s18, 3 }
  0x45   : > { %434 = vst [vmem:[#allocation2 + $0xf0] sm:$0xff] %v1920_v31  ;;  %435 = vst [vmem:[#allocation2 + $0xf8] sm:$0xff] %v1920_v31  ;;  %s2067_s17 = smul.u32 224, %s384_s13  ;;  %s2967_s8 = scalar_lea.vmem (%p1981_p5), %s3036_s4, %s1852_s5 }
  0x46   : > { %437 = vst [vmem:[#allocation2 + $0x10] sm:$0x1] %v1920_v31  ;;  %438 = vst [vmem:[#allocation2 + $0x20] sm:$0x1] %v1920_v31  ;;  %s2074_s21 = scalar_lea.vmem [#allocation4], %s1858_s14 }
  0x47   : > { %439 = vst [vmem:[#allocation2 + $0x30] sm:$0x1] %v1920_v31  ;;  %440 = vst [vmem:[#allocation2 + $0x40] sm:$0x1] %v1920_v31  ;;  %s2070_s20 = scalar_lea.vmem [#allocation3], %s2067_s17  ;;  %s2880_s30 = scalar_lea.vmem [#allocation5], %s2067_s17 }
  0x48   : > { %441 = vst [vmem:[#allocation2 + $0x50] sm:$0x1] %v1920_v31  ;;  %442 = vst [vmem:[#allocation2 + $0x60] sm:$0x1] %v1920_v31  ;;  %v468_v32 = vld [vmem:[%s2070_s20] sm:$0xff]  ;;  %v470_v34 = vld [vmem:[%s2070_s20 + $0x10] sm:$0xff] }
  0x49   : > { %443 = vst [vmem:[#allocation2 + $0x70] sm:$0x1] %v1920_v31  ;;  %444 = vst [vmem:[#allocation2 + $0x80] sm:$0x1] %v1920_v31  ;;  %v496_v33 = vmax.f32 %v468_v32, 0.0  ;;  %v498_v37 = vmax.f32 %v470_v34, 0.0 }
  0x4a   : > { %445 = vst [vmem:[#allocation2 + $0x90] sm:$0x1] %v1920_v31  ;;  %446 = vst [vmem:[#allocation2 + $0xa0] sm:$0x1] %v1920_v31  ;;  %v2077_v35 = vld [vmem:[%s2074_s21 + $0x1] ss:$0 sm:$0xff] }
  0x4b   : > { %447 = vst [vmem:[#allocation2 + $0xb0] sm:$0x1] %v1920_v31  ;;  %448 = vst [vmem:[#allocation2 + $0xc0] sm:$0x1] %v1920_v31  ;;  %v2080_v36 = vmul.f32 %v2077_v35, %v496_v33  ;;  %v2083_v38 = vld [vmem:[%s2074_s21 + $0x5] ss:$0 sm:$0xff]  ;;  %v2087_v40 = vmul.f32 %v2077_v35, %v498_v37 }
  0x4c   : > { %449 = vst [vmem:[#allocation2 + $0xd0] sm:$0x1] %v1920_v31  ;;  %450 = vst [vmem:[#allocation2 + $0xe0] sm:$0x1] %v1920_v31  ;;  %v469_v39 = vld [vmem:[%s2070_s20 + $0x8] sm:$0x3f] }
  0x4d   : > { %453 = vst [vmem:[#allocation2 + $0x1f] sm:$0x1] %v1920_v31  ;;  %454 = vst [vmem:[#allocation2 + $0x2f] sm:$0x1] %v1920_v31  ;;  %v471_v41 = vld [vmem:[%s2070_s20 + $0x18] sm:$0x3f] }
  0x4e   : > { %455 = vst [vmem:[#allocation2 + $0x3f] sm:$0x1] %v1920_v31  ;;  %456 = vst [vmem:[#allocation2 + $0x4f] sm:$0x1] %v1920_v31  ;;  %v472_v42 = vld [vmem:[%s2070_s20 + $0x20] sm:$0xff]  ;;  %v497_v43 = vmax.f32 %v469_v39, 0.0 }
  0x4f   : > { %457 = vst [vmem:[#allocation2 + $0x5f] sm:$0x1] %v1920_v31  ;;  %458 = vst [vmem:[#allocation2 + $0x6f] sm:$0x1] %v1920_v31  ;;  %v499_v44 = vmax.f32 %v471_v41, 0.0  ;;  %v500_v45 = vmax.f32 %v472_v42, 0.0 }
  0x50   : > { %459 = vst [vmem:[#allocation2 + $0x7f] sm:$0x1] %v1920_v31  ;;  %460 = vst [vmem:[#allocation2 + $0x8f] sm:$0x1] %v1920_v31  ;;  %v473_v46 = vld [vmem:[%s2070_s20 + $0x28] sm:$0x3f] }
  0x51   : > { %461 = vst [vmem:[#allocation2 + $0x9f] sm:$0x1] %v1920_v31  ;;  %462 = vst [vmem:[#allocation2 + $0xaf] sm:$0x1] %v1920_v31  ;;  %v474_v47 = vld [vmem:[%s2070_s20 + $0x30] sm:$0xff]  ;;  %v501_v49 = vmax.f32 %v473_v46, 0.0  ;;  %v2103_v55 = vmul.f32 %v2077_v35, %v500_v45  ;;  %v2106_v56 = vmul.f32 %v2083_v38, %v500_v45 }
  0x52   : > { %463 = vst [vmem:[#allocation2 + $0xbf] sm:$0x1] %v1920_v31  ;;  %464 = vst [vmem:[#allocation2 + $0xcf] sm:$0x1] %v1920_v31  ;;  %v2094_v48 = vld [vmem:[%s2074_s21] ss:$0 sm:$0xff] }
  0x53   : > { %465 = vst [vmem:[#allocation2 + $0xdf] sm:$0x1] %v1920_v31  ;;  %466 = vst [vmem:[#allocation2 + $0xef] sm:$0x1] %v1920_v31  ;;  %v502_v50 = vmax.f32 %v474_v47, 0.0  ;;  %v476_v52 = vld [vmem:[%s2070_s20 + $0x40] sm:$0xff] }
  0x54   : > { %436 = vst [vmem:[#allocation2] sm:$0x1] %v1920_v31  ;;  %451 = vst [vmem:[#allocation2 + $0xf0] sm:$0x1] %v1920_v31  ;;  %v475_v51 = vld [vmem:[%s2070_s20 + $0x38] sm:$0x3f] }
  0x55   : > { %452 = vst [vmem:[#allocation2 + $0xf] sm:$0x1] %v1920_v31  ;;  %467 = vst [vmem:[#allocation2 + $0xff] sm:$0x1] %v1920_v31  ;;  %v478_v53 = vld [vmem:[%s2070_s20 + $0x50] sm:$0xff]  ;;  %v503_v57 = vmax.f32 %v475_v51, 0.0  ;;  %v2113_v62 = vmul.f32 %v2077_v35, %v502_v50  ;;  %v2116_v63 = vmul.f32 %v2083_v38, %v502_v50 }
  0x56   : > { %525 = vst [vmem:[#allocation2 + $0x11] sm:$0xff] %v496_v33  ;;  %527 = vst [vmem:[#allocation2 + $0x21] sm:$0xff] %v498_v37  ;;  %v2100_v54 = vld [vmem:[%s2074_s21 + $0x9] ss:$0 sm:$0xff]  ;;  %v2108_v58 = vmax.f32 %v476_v52, 0.0  ;;  %v506_v1 = vmax.f32 %v478_v53, 0.0 }
  0x57   : > { %526 = vst [vmem:[#allocation2 + $0x19] sm:$0x3f] %v497_v43  ;;  %528 = vst [vmem:[#allocation2 + $0x29] sm:$0x3f] %v499_v44  ;;  %v477_v59 = vld [vmem:[%s2070_s20 + $0x48] sm:$0x3f] }
  0x58   : > { %529 = vst [vmem:[#allocation2 + $0x31] sm:$0xff] %v500_v45  ;;  %3046 = vst [vmem:[#allocation6_spill] sm:$0xff] %v2106_v56  ;;  %v479_v60 = vld [vmem:[%s2070_s20 + $0x58] sm:$0x3f]  ;;  %v505_v0 = vmax.f32 %v477_v59, 0.0  ;;  %v480_v2 = vld [vmem:[%s2070_s20 + $0x60] sm:$0xff]  ;;  %v2126_v9 = vmul.f32 %v2077_v35, %v506_v1  ;;  %v2129_v10 = vmul.f32 %v2083_v38, %v506_v1  ;;  %v2132_v11 = vmul.f32 %v2100_v54, %v506_v1 }
  0x59   : > { %530 = vst [vmem:[#allocation2 + $0x39] sm:$0x3f] %v501_v49  ;;  %531 = vst [vmem:[#allocation2 + $0x41] sm:$0xff] %v502_v50  ;;  %v481_v3 = vld [vmem:[%s2070_s20 + $0x68] sm:$0x3f]  ;;  %v507_v5 = vmax.f32 %v479_v60, 0.0 }
  0x5a   : > { %532 = vst [vmem:[#allocation2 + $0x49] sm:$0x3f] %v503_v57  ;;  %533 = vst [vmem:[#allocation2 + $0x51] sm:$0xff] %v2108_v58  ;;  %v482_v6 = vld [vmem:[%s2070_s20 + $0x70] sm:$0xff]  ;;  %v483_v7 = vld [vmem:[%s2070_s20 + $0x78] sm:$0x3f] }
  0x5b   : > { %v484_v8 = vld [vmem:[%s2070_s20 + $0x80] sm:$0xff]  ;;  %534 = vst [vmem:[#allocation2 + $0x59] sm:$0x3f] %v505_v0  ;;  %535 = vst [vmem:[#allocation2 + $0x61] sm:$0xff] %v506_v1  ;;  %v508_v12 = vmax.f32 %v480_v2, 0.0  ;;  %v509_v15 = vmax.f32 %v481_v3, 0.0 }
  0x5c   : > { %3047 = vst [vmem:[#allocation7_spill] sm:$0xff] %v2132_v11  ;;  %v485_v13 = vld [vmem:[%s2070_s20 + $0x88] sm:$0x3f]  ;;  %536 = vst [vmem:[#allocation2 + $0x69] sm:$0x3f] %v507_v5  ;;  %v510_v16 = vmax.f32 %v482_v6, 0.0 }
  0x5d   : > { %v556_v61 = vld [vmem:[#allocation2 + $0x10] sm:$0xff]  ;;  %v2135_v14 = vld [vmem:[#allocation2 + $0x20] sm:$0xff]  ;;  %v511_v17 = vmax.f32 %v483_v7, 0.0  ;;  %v512_v18 = vmax.f32 %v484_v8, 0.0  ;;  %537 = vst [vmem:[#allocation2 + $0x71] sm:$0xff] %v508_v12  ;;  %v2140_v20 = vmul.f32 %v2077_v35, %v508_v12  ;;  %v2143_v21 = vmul.f32 %v2083_v38, %v508_v12  ;;  %s426_s15 = scalar_select %p425_p10, %s1962_s18, 3 }
  0x5e   : > { %v588_v4 = vmul.f32 %v2094_v48, %v556_v61  ;;  %v590_v19 = vmul.f32 %v2094_v48, %v2135_v14  ;;  %v2146_v22 = vmul.f32 %v2100_v54, %v508_v12  ;;  %538 = vst [vmem:[#allocation2 + $0x79] sm:$0x3f] %v509_v15  ;;  %539 = vst [vmem:[#allocation2 + $0x81] sm:$0xff] %v510_v16  ;;  %v486_v27 = vld [vmem:[%s2070_s20 + $0x90] sm:$0xff]  ;;  %v513_v31 = vmax.f32 %v485_v13, 0.0  ;;  %v736_v37 = vld [vmem:[#allocation2 + $0x22] sm:$0xff] }
  0x5f   : > { %v2149_v23 = vmul.f32 %v2077_v35, %v510_v16  ;;  %v2152_v24 = vmul.f32 %v2083_v38, %v510_v16  ;;  %v2155_v25 = vmul.f32 %v2100_v54, %v510_v16  ;;  %540 = vst [vmem:[#allocation2 + $0x89] sm:$0x3f] %v511_v17  ;;  %541 = vst [vmem:[#allocation2 + $0x91] sm:$0xff] %v512_v18  ;;  %v487_v32 = vld [vmem:[%s2070_s20 + $0x98] sm:$0x3f]  ;;  %v2175_v39 = vmax.f32 %v486_v27, 0.0  ;;  %s427_s26 = scalar_lea.vmem %s3034_s2, %s426_s15  ;;  %s430_s29 = scalar_lea.vmem %s3035_s3, %s426_s15 }
  0x60   : > { %v2158_v26 = vmul.f32 %v2077_v35, %v512_v18  ;;  %v707_v28 = vadd.f32 %v2087_v40, %v590_v19  ;;  %v2163_v29 = vmul.f32 %v2083_v38, %v512_v18  ;;  %v2166_v30 = vmul.f32 %v2100_v54, %v512_v18  ;;  %v2173_v34 = vld [vmem:[%s2074_s21 + $0x2] ss:$0 sm:$0xff]  ;;  %542 = vst [vmem:[#allocation2 + $0x99] sm:$0x3f] %v513_v31  ;;  %v2178_v41 = vld [vmem:[#allocation2 + $0x30] sm:$0xff] }
  0x61   : > { %v2170_v33 = vadd.f32 %v2080_v36, %v588_v4  ;;  %v768_v40 = vmul.f32 %v2173_v34, %v736_v37  ;;  %v515_v42 = vmax.f32 %v487_v32, 0.0  ;;  %v592_v43 = vmul.f32 %v2094_v48, %v2178_v41  ;;  %v2182_v44 = vld [vmem:[#allocation2 + $0x32] sm:$0xff]  ;;  %543 = vst [vmem:[#allocation2 + $0xa1] sm:$0xff] %v2175_v39  ;;  %v562_v47 = vld [vmem:[#allocation2 + $0x40] sm:$0xff] }
  0x62   : > { %3048 = vst [vmem:[#allocation8_spill] sm:$0xff] %v2182_v44  ;;  %v770_v45 = vmul.f32 %v2173_v34, %v2182_v44  ;;  %v2191_v49 = vld [vmem:[%s2074_s21 + $0x4] ss:$0 sm:$0xff]  ;;  %v594_v50 = vmul.f32 %v2094_v48, %v562_v47  ;;  %v742_v1 = vld [vmem:[#allocation2 + $0x52] sm:$0xff]  ;;  %v951_v4 = vmul.f32 %v2083_v38, %v2108_v58  ;;  %v743_v11 = vld [vmem:[#allocation2 + $0x5a] sm:$0x3f] }
  0x63   : > { %v2185_v36 = vadd.f32 %v768_v40, %v707_v28  ;;  %544 = vst [vmem:[#allocation2 + $0xa9] sm:$0x3f] %v515_v42  ;;  %v709_v46 = vadd.f32 %v2103_v55, %v592_v43  ;;  %v2194_v51 = vld [vmem:[#allocation2 + $0x42] sm:$0xff]  ;;  %v860_v53 = vmul.f32 %v2191_v49, %v562_v47  ;;  %v2200_v60 = vld [vmem:[#allocation2 + $0x50] sm:$0xff]  ;;  %v685_v55 = vmul.f32 %v2077_v35, %v2108_v58  ;;  %v1009_v56 = vld [vmem:[#allocation2 + $0x5a] sm:$0x3f] }
  0x64   : > { %v711_v57 = vadd.f32 %v2113_v62, %v594_v50  ;;  %v772_v59 = vmul.f32 %v2173_v34, %v2194_v51  ;;  %v596_v3 = vmul.f32 %v2094_v48, %v2200_v60  ;;  %v862_v62 = vmul.f32 %v2191_v49, %v2200_v60  ;;  %v2214_v5 = vld [vmem:[%s2074_s21 + $0x6] ss:$0 sm:$0xff]  ;;  %v2219_v16 = vld [vmem:[%s2074_s21 + $0x8] ss:$0 sm:$0xff] }
  0x65   : > { %v798_v52 = vadd.f32 %v770_v45, %v709_v46  ;;  %v774_v8 = vmul.f32 %v2173_v34, %v742_v1  ;;  %v1040_v12 = vmul.f32 %v2214_v5, %v742_v1  ;;  %v566_v13 = vld [vmem:[#allocation2 + $0x60] sm:$0xff]  ;;  %v568_v45 = vld [vmem:[#allocation2 + $0x70] sm:$0xff]  ;;  %v775_v44 = vmul.f32 %v2173_v34, %v743_v11 }
  0x66   : > { %v800_v0 = vadd.f32 %v772_v59, %v711_v57  ;;  %v713_v6 = vadd.f32 %v685_v55, %v596_v3  ;;  %v2221_v17 = vld [vmem:[#allocation2 + $0x62] sm:$0xff]  ;;  %v598_v19 = vmul.f32 %v2094_v48, %v566_v13  ;;  %v864_v58 = vmul.f32 %v2191_v49, %v566_v13  ;;  %v746_v47 = vld [vmem:[#allocation2 + $0x72] sm:$0xff] }
  0x67   : > { %v888_v61 = vadd.f32 %v860_v53, %v798_v52  ;;  %v1131_v27 = vmul.f32 %v2219_v16, %v566_v13  ;;  %v776_v37 = vmul.f32 %v2173_v34, %v2221_v17  ;;  %v1042_v43 = vmul.f32 %v2214_v5, %v2221_v17  ;;  %v570_v3 = vld [vmem:[#allocation2 + $0x80] sm:$0xff] }
  0x68   : > { %v890_v7 = vadd.f32 %v862_v62, %v800_v0  ;;  %v802_v15 = vadd.f32 %v774_v8, %v713_v6  ;;  %v715_v28 = vadd.f32 %v2126_v9, %v598_v19  ;;  %v600_v50 = vmul.f32 %v2094_v48, %v568_v45  ;;  %v748_v8 = vld [vmem:[#allocation2 + $0x82] sm:$0xff] }
  0x69   : > { %v2205_v2 = vadd.f32 %v2116_v63, %v888_v61  ;;  %v866_v9 = vmul.f32 %v2191_v49, %v568_v45  ;;  %v1133_v52 = vmul.f32 %v2219_v16, %v568_v45  ;;  %v778_v59 = vmul.f32 %v2173_v34, %v746_v47  ;;  %v644_v45 = vld [vmem:[#allocation2 + $0x9] sm:$0x3f] }
  0x6a   : > { %v979_v63 = vadd.f32 %v951_v4, %v890_v7  ;;  %v892_v31 = vadd.f32 %v864_v58, %v802_v15  ;;  %v804_v42 = vadd.f32 %v776_v37, %v715_v28  ;;  %v717_v53 = vadd.f32 %v2140_v20, %v600_v50  ;;  %v572_v28 = vld [vmem:[#allocation2 + $0x90] sm:$0xff]  ;;  %v559_v50 = vld [vmem:[#allocation2 + $0x28] sm:$0x3f] }
  0x6b   : > { %3049 = vst [vmem:[#allocation9_spill] sm:$0xff] %v2205_v2  ;;  %v1044_v1 = vmul.f32 %v2214_v5, %v746_v47  ;;  %v602_v20 = vmul.f32 %v2094_v48, %v570_v3  ;;  %v1135_v13 = vmul.f32 %v2219_v16, %v570_v3  ;;  %v1007_v2 = vld [vmem:[#allocation2 + $0x4a] sm:$0x3f] }
  0x6c   : > { %v1068_v18 = vadd.f32 %v1040_v12, %v979_v63  ;;  %v981_v40 = vadd.f32 %v2129_v10, %v892_v31  ;;  %v894_v57 = vadd.f32 %v866_v9, %v804_v42  ;;  %v2240_v10 = vld [vmem:[%s2074_s21 + $0xa] ss:$0 sm:$0xff]  ;;  %v806_v0 = vadd.f32 %v778_v59, %v717_v53 }
  0x6d   : > { %v1311_v4 = vmul.f32 %v2240_v10, %v746_v47  ;;  %v868_v12 = vmul.f32 %v2191_v49, %v570_v3  ;;  %v1313_v31 = vmul.f32 %v2240_v10, %v748_v8  ;;  %v1137_v47 = vmul.f32 %v2219_v16, %v572_v28  ;;  %v648_v9 = vld [vmem:[#allocation2 + $0x29] sm:$0x3f] }
  0x6e   : > { %v2227_v32 = vadd.f32 %v1131_v27, %v1068_v18  ;;  %v1070_v46 = vadd.f32 %v1042_v43, %v981_v40  ;;  %v983_v55 = vadd.f32 %v2143_v21, %v894_v57  ;;  %v719_v21 = vadd.f32 %v2149_v23, %v602_v20  ;;  %v750_v40 = vld [vmem:[#allocation2 + $0x92] sm:$0xff]  ;;  %v555_v43 = vld [vmem:[#allocation2 + $0x8] sm:$0x3f] }
  0x6f   : > { %v896_v63 = vadd.f32 %v868_v12, %v806_v0  ;;  %v780_v18 = vmul.f32 %v2173_v34, %v748_v8  ;;  %v604_v23 = vmul.f32 %v2094_v48, %v572_v28  ;;  %v587_v57 = vmul.f32 %v2094_v48, %v555_v43  ;;  %v1117_v0 = vld [vmem:[#allocation2 + $0xf0] sm:$0xff]  ;;  %v646_v20 = vld [vmem:[#allocation2 + $0x19] sm:$0x3f] }
  0x70   : > { %3050 = vst [vmem:[#allocation10_spill] sm:$0xff] %v2227_v32  ;;  %v1161_v61 = vadd.f32 %v1133_v52, %v1070_v46  ;;  %v1072_v6 = vadd.f32 %v1044_v1, %v983_v55  ;;  %v870_v46 = vmul.f32 %v2191_v49, %v572_v28  ;;  %v676_v59 = vmul.f32 %v2077_v35, %v644_v45  ;;  %v1295_v55 = vld [vmem:[#allocation2 + $0xf2] sm:$0xff] }
  0x71   : > { %v985_v19 = vadd.f32 %v2152_v24, %v896_v63  ;;  %v808_v27 = vadd.f32 %v780_v18, %v719_v21  ;;  %v721_v24 = vadd.f32 %v2158_v26, %v604_v23  ;;  %v1048_v3 = vmul.f32 %v2214_v5, %v750_v40 }
  0x72   : > { %v1250_v62 = vadd.f32 %v2146_v22, %v1161_v61  ;;  %v1163_v15 = vadd.f32 %v1135_v13, %v1072_v6  ;;  %v1046_v22 = vmul.f32 %v2214_v5, %v748_v8  ;;  %v1206_v61 = vld [vmem:[#allocation2 + $0xf1] sm:$0xff]  ;;  %v574_v6 = vld [vmem:[#allocation2 + $0xa0] sm:$0xff]  ;;  %v591_v8 = vmul.f32 %v2094_v48, %v559_v50 }
  0x73   : > { %v898_v52 = vadd.f32 %v870_v46, %v808_v27  ;;  %v680_v12 = vmul.f32 %v2077_v35, %v648_v9  ;;  %v1315_v13 = vmul.f32 %v2240_v10, %v750_v40  ;;  %v2273_v21 = vmul.f32 %v2219_v16, %v1117_v0  ;;  %v752_v46 = vld [vmem:[#allocation2 + $0xa2] sm:$0xff]  ;;  %v739_v0 = vld [vmem:[#allocation2 + $0x3a] sm:$0x3f] }
  0x74   : > { %v2246_v7 = vadd.f32 %v1311_v4, %v1250_v62  ;;  %v1252_v58 = vadd.f32 %v2155_v25, %v1163_v15  ;;  %v1074_v37 = vadd.f32 %v1046_v22, %v985_v19  ;;  %v782_v25 = vmul.f32 %v2173_v34, %v750_v40  ;;  %v557_v62 = vld [vmem:[#allocation2 + $0x18] sm:$0x3f] }
  0x75   : > { %v987_v4 = vadd.f32 %v2163_v29, %v898_v52  ;;  %v2276_v63 = vmul.f32 %v2100_v54, %v1206_v61  ;;  %v2279_v15 = vmul.f32 %v2240_v10, %v1295_v55  ;;  %v737_v29 = vld [vmem:[#allocation2 + $0x2a] sm:$0x3f]  ;;  %v561_v22 = vld [vmem:[#allocation2 + $0x38] sm:$0x3f]  ;;  %v606_v27 = vmul.f32 %v2094_v48, %v574_v6 }
  0x76   : > { %3051 = vst [vmem:[#allocation11_spill] sm:$0xff] %v2246_v7  ;;  %v2257_v42 = vadd.f32 %v1313_v31, %v1252_v58  ;;  %v1165_v53 = vadd.f32 %v1137_v47, %v1074_v37  ;;  %v810_v1 = vadd.f32 %v782_v25, %v721_v24  ;;  %v650_v19 = vld [vmem:[#allocation2 + $0x39] sm:$0x3f]  ;;  %v2285_v28 = vadd.f32 %v676_v59, %v587_v57  ;;  %v733_v31 = vld [vmem:[#allocation2 + $0xa] sm:$0x3f] }
  0x77   : > { %3053 = vst [vmem:[#allocation13_spill] sm:$0xff] %v2279_v15  ;;  %v1076_v18 = vadd.f32 %v1048_v3, %v987_v4  ;;  %v678_v37 = vmul.f32 %v2077_v35, %v646_v20  ;;  %v734_v40 = vld [vmem:[#allocation2 + $0x12] sm:$0xff]  ;;  %v695_v23 = vmul.f32 %v2077_v35, %v2175_v39  ;;  %v872_v43 = vmul.f32 %v2191_v49, %v574_v6  ;;  %v735_v47 = vld [vmem:[#allocation2 + $0x1a] sm:$0x3f]  ;;  %v825_v52 = vld [vmem:[#allocation2 + $0x28] sm:$0x3f] }
  0x78   : > { %3052 = vst [vmem:[#allocation12_spill] sm:$0xff] %v2257_v42  ;;  %v1254_v26 = vadd.f32 %v2166_v30, %v1165_v53  ;;  %v589_v30 = vmul.f32 %v2094_v48, %v557_v62  ;;  %v961_v45 = vmul.f32 %v2083_v38, %v2175_v39  ;;  %v708_v24 = vadd.f32 %v680_v12, %v591_v8  ;;  %v488_v4 = vld [vmem:[%s2070_s20 + $0xa0] sm:$0xff]  ;;  %v827_v20 = vld [vmem:[#allocation2 + $0x38] sm:$0x3f]  ;;  %v563_v8 = vld [vmem:[#allocation2 + $0x48] sm:$0x3f] }
  0x79   : > { %v769_v25 = vmul.f32 %v2173_v34, %v737_v29  ;;  %v1139_v50 = vmul.f32 %v2219_v16, %v574_v6  ;;  %v1228_v9 = vmul.f32 %v2100_v54, %v2175_v39  ;;  %v593_v53 = vmul.f32 %v2094_v48, %v561_v22  ;;  %v1005_v22 = vld [vmem:[#allocation2 + $0x3a] sm:$0x3f] }
  0x7a   : > { %v2282_v58 = vadd.f32 %v1315_v13, %v1254_v26  ;;  %v682_v57 = vmul.f32 %v2077_v35, %v650_v19  ;;  %v723_v59 = vadd.f32 %v695_v23, %v606_v27  ;;  %v900_v61 = vadd.f32 %v872_v43, %v810_v1  ;;  %v652_v1 = vld [vmem:[#allocation2 + $0x49] sm:$0x3f]  ;;  %v565_v19 = vld [vmem:[#allocation2 + $0x58] sm:$0x3f] }
  0x7b   : > { %v2300_v55 = vmul.f32 %v2173_v34, %v734_v40  ;;  %v1167_v3 = vadd.f32 %v1139_v50, %v1076_v18  ;;  %v784_v62 = vmul.f32 %v2173_v34, %v752_v46  ;;  %v2305_v26 = vmul.f32 %v2173_v34, %v733_v31  ;;  %v654_v43 = vld [vmem:[#allocation2 + $0x59] sm:$0x3f]  ;;  %v490_v50 = vld [vmem:[%s2070_s20 + $0xb0] sm:$0xff] }
  0x7c   : > { %3054 = vst [vmem:[#allocation14_spill] sm:$0xff] %v2282_v58  ;;  %v2307_v6 = vadd.f32 %v678_v37, %v589_v30  ;;  %v2310_v39 = vmul.f32 %v2173_v34, %v735_v47  ;;  %v989_v12 = vadd.f32 %v961_v45, %v900_v61  ;;  %v1050_v13 = vmul.f32 %v2214_v5, %v752_v46  ;;  %v916_v30 = vld [vmem:[#allocation2 + $0x39] sm:$0x3f]  ;;  %v489_v47 = vld [vmem:[%s2070_s20 + $0xa8] sm:$0x3f] }
  0x7d   : > { %v2314_v29 = vmul.f32 %v2191_v49, %v825_v52  ;;  %v2318_v18 = vmul.f32 %v2191_v49, %v2178_v41  ;;  %v1256_v27 = vadd.f32 %v1228_v9, %v1167_v3  ;;  %v2320_v31 = vadd.f32 %v784_v62, %v723_v59  ;;  %v829_v59 = vld [vmem:[#allocation2 + $0x48] sm:$0x3f]  ;;  %v495_v42 = vld [vmem:[%s2070_s20 + $0xd8] sm:$0x3f] }
  0x7e   : > { %v2322_v37 = vadd.f32 %v769_v25, %v708_v24  ;;  %v710_v40 = vadd.f32 %v682_v57, %v593_v53  ;;  %v771_v23 = vmul.f32 %v2173_v34, %v739_v0  ;;  %v2325_v45 = vadd.f32 %v1050_v13, %v989_v12  ;;  %v491_v0 = vld [vmem:[%s2070_s20 + $0xb8] sm:$0x3f]  ;;  %v741_v3 = vld [vmem:[#allocation2 + $0x4a] sm:$0x3f] }
  0x7f   : > { %3055 = vst [vmem:[#allocation15_spill] sm:$0xff] %v2314_v29  ;;  %v859_v41 = vmul.f32 %v2191_v49, %v827_v20  ;;  %v595_v52 = vmul.f32 %v2094_v48, %v563_v8  ;;  %v684_v9 = vmul.f32 %v2077_v35, %v652_v1  ;;  %v1317_v24 = vmul.f32 %v2240_v10, %v752_v46  ;;  %v492_v1 = vld [vmem:[%s2070_s20 + $0xc0] sm:$0xff] }
  0x80   : > { %v2334_v25 = vmul.f32 %v2083_v38, %v916_v30  ;;  %v2337_v53 = vmul.f32 %v2214_v5, %v1005_v22  ;;  %v597_v57 = vmul.f32 %v2094_v48, %v565_v19  ;;  %v516_v61 = vmax.f32 %v488_v4, 0.0  ;;  %v493_v19 = vld [vmem:[%s2070_s20 + $0xc8] sm:$0x3f]  ;;  %v494_v4 = vld [vmem:[%s2070_s20 + $0xd0] sm:$0xff] }
  0x81   : > { %v686_v62 = vmul.f32 %v2077_v35, %v654_v43  ;;  %v2342_v20 = vadd.f32 %v1317_v24, %v1256_v27  ;;  %v517_v8 = vmax.f32 %v489_v47, 0.0  ;;  %v518_v46 = vmax.f32 %v490_v50, 0.0  ;;  %v567_v43 = vld [vmem:[#allocation2 + $0x68] sm:$0x3f] }
  0x82   : > { %3056 = vst [vmem:[#allocation16_spill] sm:$0xff] %v2334_v25  ;;  %3057 = vst [vmem:[#allocation17_spill] sm:$0xff] %v2337_v53  ;;  %v799_v12 = vadd.f32 %v771_v23, %v710_v40  ;;  %v861_v13 = vmul.f32 %v2191_v49, %v829_v59  ;;  %v697_v30 = vmul.f32 %v2077_v35, %v516_v61  ;;  %v656_v50 = vld [vmem:[#allocation2 + $0x69] sm:$0x3f]  ;;  %v522_v32 = vmax.f32 %v494_v4, 0.0 }
  0x83   : > { %3058 = vst [vmem:[#allocation18_spill] sm:$0xff] %v2342_v20  ;;  %545 = vst [vmem:[#allocation2 + $0xb1] sm:$0xff] %v516_v61  ;;  %v2348_v22 = vmul.f32 %v2083_v38, %v516_v61  ;;  %v712_v7 = vadd.f32 %v684_v9, %v595_v52  ;;  %v2354_v27 = vmul.f32 %v2100_v54, %v516_v61  ;;  %v519_v52 = vmax.f32 %v491_v0, 0.0  ;;  %v918_v24 = vld [vmem:[#allocation2 + $0x49] sm:$0x3f] }
  0x84   : > { %546 = vst [vmem:[#allocation2 + $0xb9] sm:$0x3f] %v517_v8  ;;  %547 = vst [vmem:[#allocation2 + $0xc1] sm:$0xff] %v518_v46  ;;  %v2357_v40 = vmul.f32 %v2077_v35, %v518_v46  ;;  %v2360_v23 = vmul.f32 %v2083_v38, %v518_v46  ;;  %v773_v47 = vmul.f32 %v2173_v34, %v741_v3  ;;  %v520_v9 = vmax.f32 %v492_v1, 0.0  ;;  %v831_v53 = vld [vmem:[#allocation2 + $0x58] sm:$0x3f] }
  0x85   : > { %v2364_v59 = vmul.f32 %v2100_v54, %v518_v46  ;;  %v714_v20 = vadd.f32 %v686_v62, %v597_v57  ;;  %v521_v61 = vmax.f32 %v493_v19, 0.0  ;;  %v523_v8 = vmax.f32 %v495_v42, 0.0  ;;  %548 = vst [vmem:[#allocation2 + $0xc9] sm:$0x3f] %v519_v52  ;;  %551 = vst [vmem:[#allocation2 + $0xe1] sm:$0xff] %v522_v32 }
  0x86   : > { %v599_v58 = vmul.f32 %v2094_v48, %v567_v43  ;;  %549 = vst [vmem:[#allocation2 + $0xd1] sm:$0xff] %v520_v9  ;;  %v2369_v3 = vmul.f32 %v2077_v35, %v520_v9  ;;  %v2372_v46 = vmul.f32 %v2083_v38, %v520_v9  ;;  %v688_v0 = vmul.f32 %v2077_v35, %v656_v50  ;;  %v833_v4 = vld [vmem:[#allocation2 + $0x68] sm:$0x3f] }
  0x87   : > { %v2376_v57 = vmul.f32 %v2100_v54, %v520_v9  ;;  %550 = vst [vmem:[#allocation2 + $0xd9] sm:$0x3f] %v521_v61  ;;  %v2379_v42 = vmul.f32 %v2083_v38, %v522_v32  ;;  %v2382_v11 = vmul.f32 %v2100_v54, %v522_v32  ;;  %552 = vst [vmem:[#allocation2 + $0xe9] sm:$0x3f] %v523_v8  ;;  %v745_v43 = vld [vmem:[#allocation2 + $0x6a] sm:$0x3f] }
  0x88   : > { %v2385_v62 = vadd.f32 %v859_v41, %v2322_v37  ;;  %v950_v1 = vmul.f32 %v2083_v38, %v918_v24  ;;  %v2390_v19 = vmul.f32 %v2214_v5, %v2194_v51  ;;  %v2394_v50 = vadd.f32 %v2300_v55, %v2170_v33  ;;  %v920_v41 = vld [vmem:[#allocation2 + $0x59] sm:$0x3f]  ;;  %v922_v55 = vld [vmem:[#allocation2 + $0x69] sm:$0x3f] }
  0x89   : > { %v889_v52 = vadd.f32 %v861_v13, %v799_v12  ;;  %v801_v9 = vadd.f32 %v773_v47, %v712_v7  ;;  %v1039_v32 = vmul.f32 %v2214_v5, %v1007_v2  ;;  %v863_v61 = vmul.f32 %v2191_v49, %v831_v53  ;;  %v835_v12 = vld [vmem:[#allocation2 + $0x78] sm:$0x3f] }
  0x8a   : > { %3059 = vst [vmem:[#allocation19_spill] sm:$0xff] %v2385_v62  ;;  %3060 = vst [vmem:[#allocation20_spill] sm:$0xff] %v2390_v19  ;;  %v576_v37 = vld [vmem:[#allocation2 + $0xb0] sm:$0xff]  ;;  %v803_v8 = vadd.f32 %v775_v44, %v714_v20  ;;  %v716_v62 = vadd.f32 %v688_v0, %v599_v58  ;;  %v865_v33 = vmul.f32 %v2191_v49, %v833_v4  ;;  %v569_v4 = vld [vmem:[#allocation2 + $0x78] sm:$0x3f] }
  0x8b   : > { %v608_v24 = vmul.f32 %v2094_v48, %v576_v37  ;;  %v874_v51 = vmul.f32 %v2191_v49, %v576_v37  ;;  %v1141_v19 = vmul.f32 %v2219_v16, %v576_v37  ;;  %v754_v25 = vld [vmem:[#allocation2 + $0xb2] sm:$0xff]  ;;  %v777_v7 = vmul.f32 %v2173_v34, %v745_v43  ;;  %v578_v15 = vld [vmem:[#allocation2 + $0xc0] sm:$0xff] }
  0x8c   : > { %v786_v2 = vmul.f32 %v2173_v34, %v754_v25  ;;  %v1052_v20 = vmul.f32 %v2214_v5, %v754_v25  ;;  %v978_v47 = vadd.f32 %v950_v1, %v889_v52  ;;  %v2409_v37 = vmul.f32 %v2219_v16, %v2200_v60  ;;  %v658_v43 = vld [vmem:[#allocation2 + $0x79] sm:$0x3f]  ;;  %v1011_v1 = vld [vmem:[#allocation2 + $0x6a] sm:$0x3f] }
  0x8d   : > { %v725_v53 = vadd.f32 %v697_v30, %v608_v24  ;;  %v902_v13 = vadd.f32 %v874_v51, %v2320_v31  ;;  %v1169_v44 = vadd.f32 %v1141_v19, %v2325_v45  ;;  %v891_v58 = vadd.f32 %v863_v61, %v801_v9  ;;  %v924_v51 = vld [vmem:[#allocation2 + $0x79] sm:$0x3f] }
  0x8e   : > { %3061 = vst [vmem:[#allocation21_spill] sm:$0xff] %v2409_v37  ;;  %v952_v0 = vmul.f32 %v2083_v38, %v920_v41  ;;  %v954_v30 = vmul.f32 %v2083_v38, %v922_v55  ;;  %v893_v24 = vadd.f32 %v865_v33, %v803_v8  ;;  %v805_v52 = vadd.f32 %v777_v7, %v716_v62  ;;  %v756_v8 = vld [vmem:[#allocation2 + $0xc2] sm:$0xff]  ;;  %v1187_v7 = vld [vmem:[#allocation2 + $0x59] sm:$0x3f] }
  0x8f   : > { %v991_v31 = vadd.f32 %v2348_v22, %v902_v13  ;;  %v1258_v45 = vadd.f32 %v2354_v27, %v1169_v44  ;;  %v814_v19 = vadd.f32 %v786_v2, %v725_v53  ;;  %v867_v60 = vmul.f32 %v2191_v49, %v835_v12  ;;  %v747_v27 = vld [vmem:[#allocation2 + $0x7a] sm:$0x3f] }
  0x90   : > { %v1319_v9 = vmul.f32 %v2240_v10, %v754_v25  ;;  %v601_v61 = vmul.f32 %v2094_v48, %v569_v4  ;;  %v690_v41 = vmul.f32 %v2077_v35, %v658_v43  ;;  %v610_v55 = vmul.f32 %v2094_v48, %v578_v15  ;;  %v1098_v25 = vld [vmem:[#allocation2 + $0x58] sm:$0x3f] }
  0x91   : > { %v1080_v37 = vadd.f32 %v1052_v20, %v991_v31  ;;  %v980_v29 = vadd.f32 %v952_v0, %v891_v58  ;;  %v1041_v22 = vmul.f32 %v2214_v5, %v1009_v56  ;;  %v876_v62 = vmul.f32 %v2191_v49, %v578_v15  ;;  %v1100_v20 = vld [vmem:[#allocation2 + $0x68] sm:$0x3f]  ;;  %v1013_v43 = vld [vmem:[#allocation2 + $0x7a] sm:$0x3f] }
  0x92   : > { %v2421_v2 = vadd.f32 %v1319_v9, %v1258_v45  ;;  %v2424_v33 = vadd.f32 %v1039_v32, %v978_v47  ;;  %v1043_v12 = vmul.f32 %v2214_v5, %v1011_v1  ;;  %v727_v53 = vadd.f32 %v2357_v40, %v610_v55 }
  0x93   : > { %v1143_v13 = vmul.f32 %v2219_v16, %v578_v15  ;;  %v982_v44 = vadd.f32 %v954_v30, %v893_v24  ;;  %v895_v58 = vadd.f32 %v867_v60, %v805_v52  ;;  %v956_v56 = vmul.f32 %v2083_v38, %v924_v51  ;;  %v1102_v30 = vld [vmem:[#allocation2 + $0x78] sm:$0x3f]  ;;  %v571_v24 = vld [vmem:[#allocation2 + $0x88] sm:$0x3f] }
  0x94   : > { %3062 = vst [vmem:[#allocation22_spill] sm:$0xff] %v2421_v2  ;;  %v904_v0 = vadd.f32 %v876_v62, %v814_v19  ;;  %v718_v4 = vadd.f32 %v690_v41, %v601_v61  ;;  %v779_v31 = vmul.f32 %v2173_v34, %v747_v27  ;;  %v788_v47 = vmul.f32 %v2173_v34, %v756_v8  ;;  %v660_v52 = vld [vmem:[#allocation2 + $0x89] sm:$0x3f]  ;;  %v580_v41 = vld [vmem:[#allocation2 + $0xd0] sm:$0xff] }
  0x95   : > { %v1171_v32 = vadd.f32 %v1143_v13, %v1080_v37  ;;  %v2433_v45 = vmul.f32 %v2219_v16, %v1098_v25  ;;  %v2436_v40 = vmul.f32 %v2100_v54, %v1187_v7  ;;  %v1069_v15 = vadd.f32 %v1041_v22, %v980_v29  ;;  %v837_v60 = vld [vmem:[#allocation2 + $0x88] sm:$0x3f] }
  0x96   : > { %v993_v1 = vadd.f32 %v2360_v23, %v904_v0  ;;  %v1132_v19 = vmul.f32 %v2219_v16, %v1100_v20  ;;  %v816_v37 = vadd.f32 %v788_v47, %v727_v53  ;;  %v1054_v61 = vmul.f32 %v2214_v5, %v756_v8  ;;  %v1189_v51 = vld [vmem:[#allocation2 + $0x69] sm:$0x3f]  ;;  %v1191_v23 = vld [vmem:[#allocation2 + $0x79] sm:$0x3f] }
  0x97   : > { %v1260_v9 = vadd.f32 %v2364_v59, %v1171_v32  ;;  %v1071_v55 = vadd.f32 %v1043_v12, %v982_v44  ;;  %v984_v27 = vadd.f32 %v956_v56, %v895_v58  ;;  %v1045_v62 = vmul.f32 %v2214_v5, %v1013_v43  ;;  %v1104_v13 = vld [vmem:[#allocation2 + $0x88] sm:$0x3f]  ;;  %v758_v44 = vld [vmem:[#allocation2 + $0xd2] sm:$0xff] }
  0x98   : > { %v1321_v29 = vmul.f32 %v2240_v10, %v756_v8  ;;  %v1134_v22 = vmul.f32 %v2219_v16, %v1102_v30  ;;  %v807_v25 = vadd.f32 %v779_v31, %v718_v4  ;;  %v603_v7 = vmul.f32 %v2094_v48, %v571_v24  ;;  %v926_v56 = vld [vmem:[#allocation2 + $0x89] sm:$0x3f] }
  0x99   : > { %v1082_v20 = vadd.f32 %v1054_v61, %v993_v1  ;;  %v692_v59 = vmul.f32 %v2077_v35, %v660_v52  ;;  %v869_v53 = vmul.f32 %v2191_v49, %v837_v60  ;;  %v612_v12 = vmul.f32 %v2094_v48, %v580_v41  ;;  %v749_v30 = vld [vmem:[#allocation2 + $0x8a] sm:$0x3f] }
  0x9a   : > { %v2448_v0 = vadd.f32 %v1321_v29, %v1260_v9  ;;  %v2452_v58 = vmul.f32 %v2100_v54, %v1189_v51  ;;  %v2456_v8 = vmul.f32 %v2240_v10, %v2221_v17  ;;  %v878_v4 = vmul.f32 %v2191_v49, %v580_v41  ;;  %v1278_v1 = vld [vmem:[#allocation2 + $0x6a] sm:$0x3f] }
  0x9b   : > { %v1145_v43 = vmul.f32 %v2219_v16, %v580_v41  ;;  %v1223_v31 = vmul.f32 %v2100_v54, %v1191_v23  ;;  %v1073_v32 = vadd.f32 %v1045_v62, %v984_v27  ;;  %v1136_v47 = vmul.f32 %v2219_v16, %v1104_v13  ;;  %v1193_v60 = vld [vmem:[#allocation2 + $0x89] sm:$0x3f]  ;;  %v554_v23 = vld [vmem:[#allocation2] sm:$0xff]  ;;  %v1280_v62 = vld [vmem:[#allocation2 + $0x7a] sm:$0x3f] }
  0x9c   : > { %3063 = vst [vmem:[#allocation23_spill] sm:$0xff] %v2448_v0  ;;  %v729_v24 = vadd.f32 %v2369_v3, %v612_v12  ;;  %v1162_v52 = vadd.f32 %v1134_v22, %v1071_v55  ;;  %v906_v9 = vadd.f32 %v878_v4, %v816_v37  ;;  %v790_v17 = vmul.f32 %v2173_v34, %v758_v44  ;;  %v643_v27 = vld [vmem:[#allocation2 + $0x1] sm:$0xff]  ;;  %v1015_v13 = vld [vmem:[#allocation2 + $0x8a] sm:$0x3f]  ;;  %v573_v12 = vld [vmem:[#allocation2 + $0x98] sm:$0x3f] }
  0x9d   : > { %v1173_v61 = vadd.f32 %v1145_v43, %v1082_v20  ;;  %v720_v51 = vadd.f32 %v692_v59, %v603_v7  ;;  %v897_v29 = vadd.f32 %v869_v53, %v807_v25  ;;  %v958_v0 = vmul.f32 %v2083_v38, %v926_v56  ;;  %v1282_v59 = vld [vmem:[#allocation2 + $0x8a] sm:$0x3f]  ;;  %v848_v53 = vld [vmem:[#allocation2 + $0xe0] sm:$0xff]  ;;  %v839_v56 = vld [vmem:[#allocation2 + $0x98] sm:$0x3f] }
  0x9e   : > { %v1056_v41 = vmul.f32 %v2214_v5, %v758_v44  ;;  %v781_v2 = vmul.f32 %v2173_v34, %v749_v30  ;;  %v995_v3 = vadd.f32 %v2372_v46, %v906_v9  ;;  %v818_v37 = vadd.f32 %v790_v17, %v729_v24  ;;  %v732_v24 = vld [vmem:[#allocation2 + $0x2] sm:$0xff]  ;;  %v662_v9 = vld [vmem:[#allocation2 + $0x99] sm:$0x3f] }
  0x9f   : > { %v1262_v55 = vadd.f32 %v2376_v57, %v1173_v61  ;;  %v2469_v22 = vadd.f32 %v1132_v19, %v1069_v15  ;;  %v2472_v7 = vmul.f32 %v2240_v10, %v1278_v1  ;;  %v1164_v25 = vadd.f32 %v1136_v47, %v1073_v32  ;;  %v1026_v47 = vld [vmem:[#allocation2 + $0xe2] sm:$0xff]  ;;  %v928_v61 = vld [vmem:[#allocation2 + $0x99] sm:$0x3f] }
  0xa0   : > { %v1225_v20 = vmul.f32 %v2100_v54, %v1193_v60  ;;  %v1084_v4 = vadd.f32 %v1056_v41, %v995_v3  ;;  %v1323_v43 = vmul.f32 %v2240_v10, %v758_v44  ;;  %v586_v46 = vmul.f32 %v2094_v48, %v554_v23 }
  0xa1   : > { %v675_v57 = vmul.f32 %v2077_v35, %v643_v27  ;;  %v2478_v30 = vadd.f32 %v1223_v31, %v1162_v52  ;;  %v2481_v15 = vmul.f32 %v2240_v10, %v1280_v62  ;;  %v986_v19 = vadd.f32 %v958_v0, %v897_v29  ;;  %v822_v29 = vld [vmem:[#allocation2 + $0x10] sm:$0xff]  ;;  %v823_v62 = vld [vmem:[#allocation2 + $0x18] sm:$0x3f] }
  0xa2   : > { %v1047_v32 = vmul.f32 %v2214_v5, %v1015_v13  ;;  %v809_v1 = vadd.f32 %v781_v2, %v720_v51  ;;  %v1314_v60 = vmul.f32 %v2240_v10, %v1282_v59  ;;  %v2485_v44 = vadd.f32 %v1323_v43, %v1262_v55  ;;  %v751_v43 = vld [vmem:[#allocation2 + $0x9a] sm:$0x3f] }
  0xa3   : > { %v880_v17 = vmul.f32 %v2191_v49, %v848_v53  ;;  %v1253_v41 = vadd.f32 %v1225_v20, %v1164_v25  ;;  %v605_v31 = vmul.f32 %v2094_v48, %v573_v12  ;;  %v871_v52 = vmul.f32 %v2191_v49, %v839_v56  ;;  %v1106_v20 = vld [vmem:[#allocation2 + $0x98] sm:$0x3f] }
  0xa4   : > { %v1147_v0 = vmul.f32 %v2219_v16, %v848_v53  ;;  %v1058_v27 = vmul.f32 %v2214_v5, %v1026_v47  ;;  %v703_v2 = vadd.f32 %v675_v57, %v586_v46  ;;  %v764_v51 = vmul.f32 %v2173_v34, %v732_v24  ;;  %v1195_v48 = vld [vmem:[#allocation2 + $0x99] sm:$0x3f] }
  0xa5   : > { %v908_v23 = vadd.f32 %v880_v17, %v818_v37  ;;  %v1075_v13 = vadd.f32 %v1047_v32, %v986_v19  ;;  %v694_v3 = vmul.f32 %v2077_v35, %v662_v9  ;;  %v960_v55 = vmul.f32 %v2083_v38, %v928_v61  ;;  %v1017_v19 = vld [vmem:[#allocation2 + $0x9a] sm:$0x3f] }
  0xa6   : > { %v1175_v25 = vadd.f32 %v1147_v0, %v1084_v4  ;;  %v1325_v53 = vmul.f32 %v2240_v10, %v1026_v47  ;;  %v854_v37 = vmul.f32 %v2191_v49, %v822_v29  ;;  %v856_v12 = vmul.f32 %v2191_v49, %v2135_v14  ;;  %v912_v61 = vld [vmem:[#allocation2 + $0x19] sm:$0x3f] }
  0xa7   : > { %v997_v59 = vadd.f32 %v2379_v42, %v908_v23  ;;  %v899_v56 = vadd.f32 %v871_v52, %v809_v1  ;;  %v793_v35 = vadd.f32 %v2305_v26, %v2285_v28  ;;  %v855_v4 = vmul.f32 %v2191_v49, %v823_v62  ;;  %v914_v28 = vld [vmem:[#allocation2 + $0x29] sm:$0x3f]  ;;  %v2515_v52 = vld [vmem:[#allocation2 + $0x21] sm:$0xff]  ;;  %v1284_v0 = vld [vmem:[#allocation2 + $0x9a] sm:$0x3f] }
  0xa8   : > { %v1264_v46 = vadd.f32 %v2382_v11, %v1175_v25  ;;  %v2504_v57 = vadd.f32 %v1314_v60, %v1253_v41  ;;  %v792_v32 = vadd.f32 %v764_v51, %v703_v2  ;;  %v795_v47 = vadd.f32 %v2310_v39, %v2307_v6  ;;  %v911_v11 = vld [vmem:[#allocation2 + $0x11] sm:$0xff]  ;;  %v3064_v23 = vld [vmem:[#allocation15_spill] sm:$0xff] }
  0xa9   : > { %v1086_v42 = vadd.f32 %v1058_v27, %v997_v59  ;;  %v722_v24 = vadd.f32 %v694_v3, %v605_v31  ;;  %v1138_v14 = vmul.f32 %v2219_v16, %v1106_v20  ;;  %v1227_v1 = vmul.f32 %v2100_v54, %v1195_v48  ;;  %v3065_v62 = vld [vmem:[#allocation6_spill] sm:$0xff]  ;;  %v2539_v48 = vld [vmem:[#allocation2 + $0x22] sm:$0xff] }
  0xaa   : > { %v2510_v9 = vadd.f32 %v1325_v53, %v1264_v46  ;;  %v783_v26 = vmul.f32 %v2173_v34, %v751_v43  ;;  %v882_v17 = vadd.f32 %v854_v37, %v792_v32  ;;  %v884_v41 = vadd.f32 %v856_v12, %v2394_v50  ;;  %v1001_v20 = vld [vmem:[#allocation2 + $0x1a] sm:$0x3f]  ;;  %v1003_v53 = vld [vmem:[#allocation2 + $0x2a] sm:$0x3f]  ;;  %v1091_v32 = vld [vmem:[#allocation2 + $0x20] sm:$0xff] }
  0xab   : > { %v1177_v60 = vadd.f32 %v2273_v21, %v1086_v42  ;;  %v988_v6 = vadd.f32 %v960_v55, %v899_v56  ;;  %v1049_v39 = vmul.f32 %v2214_v5, %v1017_v19  ;;  %v883_v31 = vadd.f32 %v855_v4, %v793_v35  ;;  %v1000_v55 = vld [vmem:[#allocation2 + $0x12] sm:$0xff]  ;;  %v3068_v12 = vld [vmem:[#allocation16_spill] sm:$0xff] }
  0xac   : > { %v886_v54 = vadd.f32 %v2318_v18, %v2185_v36  ;;  %v885_v27 = vadd.f32 %v3064_v23, %v795_v47  ;;  %v943_v34 = vmul.f32 %v2083_v38, %v911_v11  ;;  %v944_v21 = vmul.f32 %v2083_v38, %v912_v61  ;;  %v3066_v18 = vld [vmem:[#allocation13_spill] sm:$0xff]  ;;  %v1096_v46 = vld [vmem:[#allocation2 + $0x48] sm:$0x3f] }
  0xad   : > { %v1266_v29 = vadd.f32 %v2276_v63, %v1177_v60  ;;  %v1166_v2 = vadd.f32 %v1138_v14, %v1075_v13  ;;  %v945_v50 = vmul.f32 %v2083_v38, %v2515_v52  ;;  %v946_v51 = vmul.f32 %v2083_v38, %v914_v28  ;;  %v1092_v47 = vld [vmem:[#allocation2 + $0x28] sm:$0x3f]  ;;  %v1094_v60 = vld [vmem:[#allocation2 + $0x38] sm:$0x3f] }
  0xae   : > { %v975_v3 = vadd.f32 %v3065_v62, %v886_v54  ;;  %v2530_v36 = vadd.f32 %v2452_v58, %v2469_v22  ;;  %v2534_v63 = vadd.f32 %v2481_v15, %v2478_v30  ;;  %v971_v13 = vadd.f32 %v943_v34, %v882_v17  ;;  %v3067_v15 = vld [vmem:[#allocation19_spill] sm:$0xff]  ;;  %v3070_v61 = vld [vmem:[#allocation8_spill] sm:$0xff] }
  0xaf   : > { %v2537_v25 = vadd.f32 %v3066_v18, %v1266_v29  ;;  %v2543_v38 = vmul.f32 %v2504_v57, %v2504_v57  ;;  %v2546_v59 = vmul.f32 %v2240_v10, %v1284_v0  ;;  %v972_v58 = vadd.f32 %v944_v21, %v883_v31  ;;  %v1095_v17 = vld [vmem:[#allocation2 + $0x40] sm:$0xff]  ;;  %v3071_v31 = vld [vmem:[#allocation17_spill] sm:$0xff]  ;;  %v3073_v29 = vld [vmem:[#allocation20_spill] sm:$0xff] }
  0xb0   : > { %v973_v22 = vadd.f32 %v945_v50, %v884_v41  ;;  %v2548_v37 = vadd.f32 %v783_v26, %v722_v24  ;;  %v974_v30 = vadd.f32 %v946_v51, %v885_v27  ;;  %v976_v56 = vadd.f32 %v3068_v12, %v3067_v15  ;;  %v3069_v24 = vld [vmem:[#allocation14_spill] sm:$0xff]  ;;  %v1093_v26 = vld [vmem:[#allocation2 + $0x30] sm:$0xff]  ;;  %v575_v41 = vld [vmem:[#allocation2 + $0xa8] sm:$0x3f] }
  0xb1   : > { %v1032_v43 = vmul.f32 %v2214_v5, %v1000_v55  ;;  %v2553_v35 = vadd.f32 %v1227_v1, %v1166_v2  ;;  %v2555_v4 = vadd.f32 %v1049_v39, %v988_v6  ;;  %v1033_v19 = vmul.f32 %v2214_v5, %v1001_v20  ;;  %v3072_v0 = vld [vmem:[#allocation9_spill] sm:$0xff]  ;;  %v664_v27 = vld [vmem:[#allocation2 + $0xa9] sm:$0x3f]  ;;  %v1183_v20 = vld [vmem:[#allocation2 + $0x39] sm:$0x3f] }
  0xb2   : > { %v1034_v42 = vmul.f32 %v2214_v5, %v2539_v48  ;;  %v2562_v14 = vmul.f32 %v3069_v24, %v3069_v24  ;;  %v1035_v11 = vmul.f32 %v2214_v5, %v1003_v53  ;;  %v1036_v28 = vmul.f32 %v2214_v5, %v3070_v61  ;;  %v1181_v18 = vld [vmem:[#allocation2 + $0x29] sm:$0x3f]  ;;  %v3074_v15 = vld [vmem:[#allocation21_spill] sm:$0xff] }
  0xb3   : > { %v1060_v1 = vadd.f32 %v1032_v43, %v971_v13  ;;  %v1061_v6 = vadd.f32 %v1033_v19, %v972_v58  ;;  %v1065_v54 = vadd.f32 %v3071_v31, %v976_v56  ;;  %v1066_v23 = vadd.f32 %v3073_v29, %v3072_v0  ;;  %v1182_v13 = vld [vmem:[#allocation2 + $0x31] sm:$0xff]  ;;  %v2577_v58 = vld [vmem:[%s2074_s21] ss:$0 sm:$0xff]  ;;  %v1184_v56 = vld [vmem:[#allocation2 + $0x41] sm:$0xff] }
  0xb4   : > { %v1062_v39 = vadd.f32 %v1034_v42, %v973_v22  ;;  %v1063_v34 = vadd.f32 %v1035_v11, %v974_v30  ;;  %v1064_v21 = vadd.f32 %v1036_v28, %v975_v3  ;;  %v1123_v2 = vmul.f32 %v2219_v16, %v1091_v32  ;;  %v841_v22 = vld [vmem:[#allocation2 + $0xa8] sm:$0x3f]  ;;  %v1271_v29 = vld [vmem:[#allocation2 + $0x32] sm:$0xff] }
  0xb5   : > { %v1124_v5 = vmul.f32 %v2219_v16, %v1092_v47  ;;  %v1125_v50 = vmul.f32 %v2219_v16, %v1093_v26  ;;  %v1126_v51 = vmul.f32 %v2219_v16, %v1094_v60  ;;  %v1127_v62 = vmul.f32 %v2219_v16, %v1095_v17  ;;  %v2584_v43 = vld [vmem:[%s2074_s21 + $0x1] ss:$0 sm:$0xff]  ;;  %v2588_v61 = vld [vmem:[%s2074_s21 + $0x9] ss:$0 sm:$0xff] }
  0xb6   : > { %v1128_v55 = vmul.f32 %v2219_v16, %v1096_v46  ;;  %v2580_v3 = vmul.f32 %v2577_v58, %v575_v41  ;;  %v1151_v53 = vadd.f32 %v1123_v2, %v1060_v1  ;;  %v1157_v12 = vadd.f32 %v3074_v15, %v1066_v23  ;;  %v930_v47 = vld [vmem:[#allocation2 + $0xa9] sm:$0x3f]  ;;  %v1272_v23 = vld [vmem:[#allocation2 + $0x3a] sm:$0x3f] }
  0xb7   : > { %v1152_v30 = vadd.f32 %v1124_v5, %v1061_v6  ;;  %v696_v19 = vmul.f32 %v2584_v43, %v664_v27  ;;  %v1153_v46 = vadd.f32 %v1125_v50, %v1062_v39  ;;  %v1154_v42 = vadd.f32 %v1126_v51, %v1063_v34  ;;  %v1185_v11 = vld [vmem:[#allocation2 + $0x49] sm:$0x3f]  ;;  %v1889_v39 = vld [vmem:[#allocation2 + $0x51] sm:$0xff] }
  0xb8   : > { %v1155_v32 = vadd.f32 %v1127_v62, %v1064_v21  ;;  %v1212_v28 = vmul.f32 %v2588_v61, %v2515_v52  ;;  %v1213_v1 = vmul.f32 %v2588_v61, %v1181_v18  ;;  %v1214_v26 = vmul.f32 %v2588_v61, %v1182_v13  ;;  %v1270_v0 = vld [vmem:[#allocation2 + $0x2a] sm:$0x3f]  ;;  %v1273_v5 = vld [vmem:[#allocation2 + $0x42] sm:$0xff]  ;;  %v1275_v50 = vld [vmem:[#allocation2 + $0x52] sm:$0xff] }
  0xb9   : > { %v1215_v60 = vmul.f32 %v2588_v61, %v1183_v20  ;;  %v873_v17 = vmul.f32 %v2191_v49, %v841_v22  ;;  %v1156_v41 = vadd.f32 %v1128_v55, %v1065_v54  ;;  %v1216_v6 = vmul.f32 %v2588_v61, %v1184_v56  ;;  %v1108_v27 = vld [vmem:[#allocation2 + $0xa8] sm:$0x3f]  ;;  %v3075_v62 = vld [vmem:[#allocation10_spill] sm:$0xff]  ;;  %v3076_v55 = vld [vmem:[#allocation7_spill] sm:$0xff] }
  0xba   : > { %v1218_v31 = vmul.f32 %v1889_v39, %v2588_v61  ;;  %v1240_v52 = vadd.f32 %v1212_v28, %v1151_v53  ;;  %v1241_v34 = vadd.f32 %v1213_v1, %v1152_v30  ;;  %v1242_v21 = vadd.f32 %v1214_v26, %v1153_v46  ;;  %v2607_v30 = vld [vmem:[%s2074_s21 + $0x5] ss:$0 sm:$0xff]  ;;  %v1274_v46 = vld [vmem:[#allocation2 + $0x4a] sm:$0x3f] }
  0xbb   : > { %v1243_v2 = vadd.f32 %v1215_v60, %v1154_v42  ;;  %v1217_v51 = vmul.f32 %v2588_v61, %v1185_v11  ;;  %v1244_v49 = vadd.f32 %v1216_v6, %v1155_v32  ;;  %v1248_v18 = vadd.f32 %v3076_v55, %v3075_v62  ;;  %v1197_v32 = vld [vmem:[#allocation2 + $0xa9] sm:$0x3f] }
  0xbc   : > { %v1246_v54 = vadd.f32 %v1218_v31, %v1157_v12  ;;  %v1301_v13 = vmul.f32 %v2240_v10, %v2539_v48  ;;  %v1302_v20 = vmul.f32 %v2240_v10, %v1270_v0  ;;  %v1303_v22 = vmul.f32 %v2240_v10, %v1271_v29  ;;  %v1019_v39 = vld [vmem:[#allocation2 + $0xaa] sm:$0x3f] }
  0xbd   : > { %v1304_v53 = vmul.f32 %v2240_v10, %v1272_v23  ;;  %v962_v15 = vmul.f32 %v2607_v30, %v930_v47  ;;  %v1140_v56 = vmul.f32 %v2219_v16, %v1108_v27  ;;  %v1305_v12 = vmul.f32 %v2240_v10, %v1273_v5  ;;  %v753_v47 = vld [vmem:[#allocation2 + $0xaa] sm:$0x3f] }
  0xbe   : > { %v1307_v42 = vmul.f32 %v2240_v10, %v1275_v50  ;;  %v2613_v11 = vadd.f32 %v1301_v13, %v1240_v52  ;;  %v2615_v48 = vadd.f32 %v1302_v20, %v1241_v34  ;;  %v2617_v28 = vadd.f32 %v1303_v22, %v1242_v21  ;;  %v2643_v52 = vld [vmem:[%s2074_s21 + $0x2] ss:$0 sm:$0xff]  ;;  %v577_v34 = vld [vmem:[#allocation2 + $0xb8] sm:$0x3f] }
  0xbf   : > { %v2619_v1 = vadd.f32 %v1304_v53, %v1243_v2  ;;  %v901_v26 = vadd.f32 %v873_v17, %v2548_v37  ;;  %v1158_v16 = vadd.f32 %v2433_v45, %v2424_v33  ;;  %v2624_v60 = vadd.f32 %v1305_v12, %v1244_v49  ;;  %v1276_v17 = vld [vmem:[#allocation2 + $0x5a] sm:$0x3f] }
  0xc0   : > { %v2626_v6 = vadd.f32 %v1307_v42, %v1246_v54  ;;  %v1245_v31 = vadd.f32 %v1217_v51, %v1156_v41  ;;  %v1306_v0 = vmul.f32 %v2240_v10, %v1274_v46  ;;  %v2630_v29 = vadd.f32 %v2456_v8, %v1248_v18  ;;  %v666_v21 = vld [vmem:[#allocation2 + $0xb9] sm:$0x3f] }
  0xc1   : > { %v1358_v37 = vsel %vm1357_vm0, %v2615_v48, 0.0  ;;  %v2636_v23 = vadd.f32 %v2546_v59, %v2553_v35  ;;  %v724_v33 = vadd.f32 %v696_v19, %v2580_v3  ;;  %v1229_v45 = vmul.f32 %v2588_v61, %v1197_v32  ;;  %v1286_v3 = vld [vmem:[#allocation2 + $0xaa] sm:$0x3f]  ;;  %v2651_v19 = vld [vmem:[%s2074_s21 + $0x6] ss:$0 sm:$0xff] }
  0xc2   : > { %v1359_v41 = vadd.f32 %v1358_v37, %v2613_v11  ;;  %v1168_v27 = vadd.f32 %v1140_v56, %v2555_v4  ;;  %v785_v8 = vmul.f32 %v2643_v52, %v753_v47  ;;  %v1361_v2 = vsel %vm1357_vm0, %v2619_v1, 0.0  ;;  %v843_v13 = vld [vmem:[#allocation2 + $0xb8] sm:$0x3f]  ;;  %v579_v32 = vld [vmem:[#allocation2 + $0xc8] sm:$0x3f] }
  0xc3   : > { %v1406_v59 = vmul.f32 %v2615_v48, %v2615_v48  ;;  %v990_v35 = vadd.f32 %v962_v15, %v901_v26  ;;  %v1051_v5 = vmul.f32 %v2651_v19, %v1019_v39  ;;  %v1405_v50 = vmul.f32 %v2613_v11, %v2613_v11  ;;  %v755_v56 = vld [vmem:[#allocation2 + $0xba] sm:$0x3f]  ;;  %v668_v26 = vld [vmem:[#allocation2 + $0xc9] sm:$0x3f]  ;;  %v2675_v39 = vld [vmem:[%s2074_s21 + $0x4] ss:$0 sm:$0xff] }
  0xc4   : > { %v1360_v4 = vadd.f32 %v1359_v41, %v2617_v28  ;;  %v1247_v51 = vadd.f32 %v2436_v40, %v1158_v16  ;;  %v1308_v49 = vmul.f32 %v2240_v10, %v1276_v17  ;;  %v2659_v54 = vadd.f32 %v1306_v0, %v1245_v31  ;;  %v932_v0 = vld [vmem:[#allocation2 + $0xb9] sm:$0x3f] }
  0xc5   : > { %v1408_v62 = vmul.f32 %v2619_v1, %v2619_v1  ;;  %v609_v55 = vmul.f32 %v2577_v58, %v577_v34  ;;  %v698_v18 = vmul.f32 %v2584_v43, %v666_v21  ;;  %v1407_v22 = vmul.f32 %v2617_v28, %v2617_v28  ;;  %v1199_v41 = vld [vmem:[#allocation2 + $0xb9] sm:$0x3f] }
  0xc6   : > { %v1362_v20 = vadd.f32 %v1361_v2, %v1360_v4  ;;  %v2669_v40 = vsel %vm1357_vm0, %v2636_v23, 0.0  ;;  %v1257_v53 = vadd.f32 %v1229_v45, %v1168_v27  ;;  %v1318_v15 = vmul.f32 %v2240_v10, %v1286_v3  ;;  %v1110_v45 = vld [vmem:[#allocation2 + $0xb8] sm:$0x3f] }
  0xc7   : > { %v1433_v46 = vsel %vm1357_vm0, %v1406_v59, 0.0  ;;  %v813_v12 = vadd.f32 %v785_v8, %v724_v33  ;;  %v1079_v42 = vadd.f32 %v1051_v5, %v990_v35  ;;  %v875_v31 = vmul.f32 %v2675_v39, %v843_v13  ;;  %v845_v5 = vld [vmem:[#allocation2 + $0xc8] sm:$0x3f] }
  0xc8   : > { %v1363_v47 = vadd.f32 %v1362_v20, %v2624_v60  ;;  %v1434_v16 = vadd.f32 %v1433_v46, %v1405_v50  ;;  %v2678_v37 = vadd.f32 %v1308_v49, %v1247_v51  ;;  %v1364_v10 = vsel %vm1357_vm0, %v2659_v54, 0.0  ;;  %v2695_v49 = vld [vmem:[%s2074_s21 + $0x8] ss:$0 sm:$0xff] }
  0xc9   : > { %v1436_v17 = vsel %vm1357_vm0, %v1408_v62, 0.0  ;;  %v726_v33 = vadd.f32 %v698_v18, %v609_v55  ;;  %v787_v27 = vmul.f32 %v2643_v52, %v755_v56  ;;  %v2684_v21 = vadd.f32 %v1318_v15, %v1257_v53  ;;  %v757_v18 = vld [vmem:[#allocation2 + $0xca] sm:$0x3f]  ;;  %v581_v15 = vld [vmem:[#allocation2 + $0xd8] sm:$0x3f] }
  0xca   : > { %v1365_v8 = vadd.f32 %v1364_v10, %v1363_v47  ;;  %v1435_v34 = vadd.f32 %v1434_v16, %v1407_v22  ;;  %v611_v2 = vmul.f32 %v2577_v58, %v579_v32  ;;  %v700_v59 = vmul.f32 %v2584_v43, %v668_v26  ;;  %v670_v56 = vld [vmem:[#allocation2 + $0xd9] sm:$0x3f] }
  0xcb   : > { %v1410_v35 = vmul.f32 %v2659_v54, %v2659_v54  ;;  %v964_v3 = vmul.f32 %v2607_v30, %v932_v0  ;;  %v1409_v50 = vmul.f32 %v2624_v60, %v2624_v60  ;;  %v1142_v62 = vmul.f32 %v2695_v49, %v1110_v45  ;;  %v1021_v26 = vld [vmem:[#allocation2 + $0xba] sm:$0x3f] }
  0xcc   : > { %v1366_v4 = vadd.f32 %v1365_v8, %v2626_v6  ;;  %v1437_v51 = vadd.f32 %v1436_v17, %v1435_v34  ;;  %v2699_v55 = vmul.f32 %v2588_v61, %v1199_v41  ;;  %v2703_v13 = vadd.f32 %v2472_v7, %v2530_v36  ;;  %v934_v7 = vld [vmem:[#allocation2 + $0xc9] sm:$0x3f] }
  0xcd   : > { %v1367_v20 = vsel %vm1357_vm0, %v2678_v37, 0.0  ;;  %v903_v22 = vadd.f32 %v875_v31, %v813_v12  ;;  %v815_v53 = vadd.f32 %v787_v27, %v726_v33  ;;  %v728_v47 = vadd.f32 %v700_v59, %v611_v2  ;;  %v847_v2 = vld [vmem:[#allocation2 + $0xd8] sm:$0x3f] }
  0xce   : > { %v1368_v46 = vadd.f32 %v1367_v20, %v1366_v4  ;;  %v1438_v32 = vadd.f32 %v1437_v51, %v1409_v50  ;;  %v877_v16 = vmul.f32 %v2675_v39, %v845_v5  ;;  %v1412_v0 = vmul.f32 %v2678_v37, %v2678_v37  ;;  %v759_v59 = vld [vmem:[#allocation2 + $0xda] sm:$0x3f]  ;;  %v1112_v51 = vld [vmem:[#allocation2 + $0xc8] sm:$0x3f] }
  0xcf   : > { %v1439_v10 = vsel %vm1357_vm0, %v1410_v35, 0.0  ;;  %v789_v36 = vmul.f32 %v2643_v52, %v757_v18  ;;  %v1411_v12 = vmul.f32 %v2626_v6, %v2626_v6  ;;  %v1170_v33 = vadd.f32 %v1142_v62, %v1079_v42  ;;  %v3077_v18 = vld [vmem:[#allocation11_spill] sm:$0xff] }
  0xd0   : > { %v1369_v17 = vadd.f32 %v1368_v46, %v2630_v29  ;;  %v1440_v31 = vadd.f32 %v1439_v10, %v1438_v32  ;;  %v613_v45 = vmul.f32 %v2577_v58, %v581_v15  ;;  %v702_v41 = vmul.f32 %v2584_v43, %v670_v56  ;;  %v1023_v43 = vld [vmem:[#allocation2 + $0xca] sm:$0x3f] }
  0xd1   : > { %v1370_v27 = vsel %vm1357_vm0, %v2703_v13, 0.0  ;;  %v992_v8 = vadd.f32 %v964_v3, %v903_v22  ;;  %v1053_v34 = vmul.f32 %v2651_v19, %v1021_v26  ;;  %v905_v4 = vadd.f32 %v877_v16, %v815_v53  ;;  %v936_v53 = vld [vmem:[#allocation2 + $0xd9] sm:$0x3f] }
  0xd2   : > { %v1371_v35 = vadd.f32 %v1370_v27, %v1369_v17  ;;  %v1441_v5 = vadd.f32 %v1440_v31, %v1411_v12  ;;  %v966_v50 = vmul.f32 %v2607_v30, %v934_v7  ;;  %v1414_v42 = vmul.f32 %v2703_v13, %v2703_v13  ;;  %v1288_v7 = vld [vmem:[#allocation2 + $0xba] sm:$0x3f] }
  0xd3   : > { %v1442_v58 = vsel %vm1357_vm0, %v1412_v0, 0.0  ;;  %v817_v62 = vadd.f32 %v789_v36, %v728_v47  ;;  %v1413_v3 = vmul.f32 %v2630_v29, %v2630_v29  ;;  %v730_v15 = vadd.f32 %v702_v41, %v613_v45  ;;  %v849_v0 = vld [vmem:[#allocation2 + $0xe8] sm:$0x3f] }
  0xd4   : > { %v1372_v20 = vadd.f32 %v1371_v35, %v3077_v18  ;;  %v1443_v22 = vadd.f32 %v1442_v58, %v1441_v5  ;;  %v879_v56 = vmul.f32 %v2675_v39, %v847_v2  ;;  %v791_v46 = vmul.f32 %v2643_v52, %v759_v59  ;;  %v1201_v52 = vld [vmem:[#allocation2 + $0xc9] sm:$0x3f]  ;;  %v1114_v59 = vld [vmem:[#allocation2 + $0xd8] sm:$0x3f] }
  0xd5   : > { %v1373_v32 = vsel %vm1357_vm0, %v2534_v63, 0.0  ;;  %v1081_v26 = vadd.f32 %v1053_v34, %v992_v8  ;;  %v1144_v16 = vmul.f32 %v2695_v49, %v1112_v51  ;;  %v994_v36 = vadd.f32 %v966_v50, %v905_v4  ;;  %v3078_v41 = vld [vmem:[#allocation12_spill] sm:$0xff]  ;;  %v1025_v58 = vld [vmem:[#allocation2 + $0xda] sm:$0x3f] }
  0xd6   : > { %v1374_v47 = vadd.f32 %v1373_v32, %v1372_v20  ;;  %v1444_v10 = vadd.f32 %v1443_v22, %v1413_v3  ;;  %v1055_v17 = vmul.f32 %v2651_v19, %v1023_v43  ;;  %v1416_v12 = vmul.f32 %v2534_v63, %v2534_v63  ;;  %v2745_v51 = vld [vmem:[%s2074_s21 + $0xa] ss:$0 sm:$0xff] }
  0xd7   : > { %v1445_v31 = vsel %vm1357_vm0, %v1414_v42, 0.0  ;;  %v968_v45 = vmul.f32 %v2607_v30, %v936_v53  ;;  %v1415_v8 = vmul.f32 %v3077_v18, %v3077_v18  ;;  %v907_v2 = vadd.f32 %v879_v56, %v817_v62  ;;  %v938_v43 = vld [vmem:[#allocation2 + $0xe9] sm:$0x3f] }
  0xd8   : > { %v1375_v27 = vadd.f32 %v1374_v47, %v3078_v41  ;;  %v1446_v34 = vadd.f32 %v1445_v31, %v1444_v10  ;;  %v819_v35 = vadd.f32 %v791_v46, %v730_v15  ;;  %v881_v5 = vmul.f32 %v2675_v39, %v849_v0  ;;  %v1290_v39 = vld [vmem:[#allocation2 + $0xca] sm:$0x3f]  ;;  %v1203_v0 = vld [vmem:[#allocation2 + $0xd9] sm:$0x3f] }
  0xd9   : > { %v1376_v4 = vsel %vm1357_vm0, %v2504_v57, 0.0  ;;  %v1259_v50 = vadd.f32 %v2699_v55, %v1170_v33  ;;  %v1320_v42 = vmul.f32 %v2745_v51, %v1288_v7  ;;  %v1172_v22 = vadd.f32 %v1144_v16, %v1081_v26 }
  0xda   : > { %v1377_v20 = vadd.f32 %v1376_v4, %v1375_v27  ;;  %v1447_v3 = vadd.f32 %v1446_v34, %v1415_v8  ;;  %v1233_v62 = vmul.f32 %v2588_v61, %v1201_v52  ;;  %v1083_v56 = vadd.f32 %v1055_v17, %v994_v36  ;;  %v1116_v36 = vld [vmem:[#allocation2 + $0xe8] sm:$0x3f]  ;;  %v1118_v52 = vld [vmem:[#allocation2 + $0xf8] sm:$0x3f] }
  0xdb   : > { %v1448_v15 = vsel %vm1357_vm0, %v1416_v12, 0.0  ;;  %v1146_v53 = vmul.f32 %v2695_v49, %v1114_v59  ;;  %v1417_v55 = vmul.f32 %v3078_v41, %v3078_v41  ;;  %v996_v32 = vadd.f32 %v968_v45, %v907_v2  ;;  %v1027_v17 = vld [vmem:[#allocation2 + $0xea] sm:$0x3f]  ;;  %v3079_v59 = vld [vmem:[#allocation18_spill] sm:$0xff] }
  0xdc   : > { %v1378_v46 = vadd.f32 %v1377_v20, %v3069_v24  ;;  %v1449_v33 = vadd.f32 %v1448_v15, %v1447_v3  ;;  %v1057_v47 = vmul.f32 %v2651_v19, %v1025_v58  ;;  %v909_v10 = vadd.f32 %v881_v5, %v819_v35  ;;  %v1292_v4 = vld [vmem:[#allocation2 + $0xda] sm:$0x3f]  ;;  %v1205_v20 = vld [vmem:[#allocation2 + $0xe9] sm:$0x3f] }
  0xdd   : > { %v970_v26 = vmul.f32 %v2607_v30, %v938_v43  ;;  %v1420_v16 = vmul.f32 %v2636_v23, %v2636_v23  ;;  %v1382_v7 = vsel %vm1357_vm0, %v2684_v21, 0.0  ;;  %v2761_v27 = vadd.f32 %v1320_v42, %v1259_v50 }
  0xde   : > { %v1380_v12 = vadd.f32 %v2669_v40, %v1378_v46  ;;  %v1450_v31 = vadd.f32 %v1449_v33, %v1417_v55  ;;  %v1261_v45 = vadd.f32 %v1233_v62, %v1172_v22  ;;  %v1322_v8 = vmul.f32 %v2745_v51, %v1290_v39  ;;  %v1207_v39 = vld [vmem:[#allocation2 + $0xf9] sm:$0x3f] }
  0xdf   : > { %v1451_v30 = vsel %vm1357_vm0, %v2543_v38, 0.0  ;;  %v1174_v34 = vadd.f32 %v1146_v53, %v1083_v56  ;;  %v1235_v2 = vmul.f32 %v2588_v61, %v1203_v0  ;;  %v1085_v58 = vadd.f32 %v1057_v47, %v996_v32  ;;  %v1294_v47 = vld [vmem:[#allocation2 + $0xea] sm:$0x3f] }
  0xe0   : > { %v1381_v35 = vadd.f32 %v1380_v12, %v3079_v59  ;;  %v1452_v5 = vadd.f32 %v1451_v30, %v1450_v31  ;;  %v998_v43 = vadd.f32 %v970_v26, %v909_v10  ;;  %v1148_v40 = vmul.f32 %v2695_v49, %v1116_v36  ;;  %v3081_v31 = vld [vmem:[#allocation23_spill] sm:$0xff] }
  0xe1   : > { %v1059_v50 = vmul.f32 %v2651_v19, %v1027_v17  ;;  %v1150_v42 = vmul.f32 %v2695_v49, %v1118_v52  ;;  %v1454_v38 = vsel %vm1357_vm0, %v1420_v16, 0.0  ;;  %v1421_v62 = vmul.f32 %v3079_v59, %v3079_v59  ;;  %v3080_v49 = vld [vmem:[#allocation22_spill] sm:$0xff] }
  0xe2   : > { %v1383_v3 = vadd.f32 %v1382_v7, %v1381_v35  ;;  %v1453_v22 = vadd.f32 %v1452_v5, %v2562_v14  ;;  %v1422_v56 = vmul.f32 %v2684_v21, %v2684_v21  ;;  %v1385_v15 = vsel %vm1357_vm0, %v2761_v27, 0.0 }
  0xe3   : > { %v2779_v53 = vadd.f32 %v1322_v8, %v1261_v45  ;;  %v1324_v19 = vmul.f32 %v2745_v51, %v1292_v4  ;;  %v1263_v14 = vadd.f32 %v1235_v2, %v1174_v34  ;;  %v1176_v33 = vadd.f32 %v1148_v40, %v1085_v58  ;;  %v1296_v2 = vld [vmem:[#allocation2 + $0xfa] sm:$0x3f] }
  0xe4   : > { %v1384_v46 = vadd.f32 %v1383_v3, %v3080_v49  ;;  %v1455_v55 = vadd.f32 %v1454_v38, %v1453_v22  ;;  %v1237_v32 = vmul.f32 %v2588_v61, %v1205_v20  ;;  %v1087_v0 = vadd.f32 %v1059_v50, %v998_v43 }
  0xe5   : > { %v1239_v16 = vmul.f32 %v2588_v61, %v1207_v39  ;;  %v1457_v7 = vsel %vm1357_vm0, %v1422_v56, 0.0  ;;  %v1424_v36 = vmul.f32 %v2761_v27, %v2761_v27  ;;  %v1423_v17 = vmul.f32 %v3080_v49, %v3080_v49 }
  0xe6   : > { %v1386_v10 = vadd.f32 %v1385_v15, %v1384_v46  ;;  %v1456_v26 = vadd.f32 %v1455_v55, %v1421_v62  ;;  %v1388_v12 = vsel %vm1357_vm0, %v2779_v53, 0.0  ;;  %v2793_v8 = vadd.f32 %v1324_v19, %v1263_v14 }
  0xe7   : > { %v1265_v30 = vadd.f32 %v1237_v32, %v1176_v33  ;;  %v1178_v34 = vadd.f32 %v1150_v42, %v1087_v0  ;;  %v1326_v61 = vmul.f32 %v2745_v51, %v1294_v47  ;;  %v1460_v4 = vsel %vm1357_vm0, %v1424_v36, 0.0 }
  0xe8   : > { %v1387_v52 = vadd.f32 %v1386_v10, %v3081_v31  ;;  %v1458_v45 = vadd.f32 %v1457_v7, %v1456_v26  ;;  %v1426_v58 = vmul.f32 %v2779_v53, %v2779_v53  ;;  %v1425_v43 = vmul.f32 %v3081_v31, %v3081_v31 }
  0xe9   : > { %v1328_v20 = vmul.f32 %v2745_v51, %v1296_v2  ;;  %v1391_v42 = vsel %vm1357_vm0, %v2793_v8, 0.0  ;;  %v1267_v3 = vadd.f32 %v1239_v16, %v1178_v34  ;;  %v2805_v22 = vadd.f32 %v1326_v61, %v1265_v30 }
  0xea   : > { %v1389_v35 = vadd.f32 %v1388_v12, %v1387_v52  ;;  %v1459_v5 = vadd.f32 %v1458_v45, %v1423_v17  ;;  %v1463_v56 = vsel %vm1357_vm0, %v1426_v58, 0.0  ;;  %v1428_v15 = vmul.f32 %v2793_v8, %v2793_v8 }
  0xeb   : > { %v1427_v39 = vmul.f32 %v2485_v44, %v2485_v44  ;;  %v2813_v51 = vadd.f32 %v1328_v20, %v1267_v3  ;;  %v1394_v55 = vsel %vm1357_vm0, %v2805_v22, 0.0  ;;  %v1430_v0 = vmul.f32 %v2805_v22, %v2805_v22 }
  0xec   : > { %v1390_v40 = vadd.f32 %v1389_v35, %v2485_v44  ;;  %v1461_v50 = vadd.f32 %v1460_v4, %v1459_v5  ;;  %v1466_v32 = vsel %vm1357_vm0, %v1428_v15, 0.0  ;;  %v1429_v47 = vmul.f32 %v2510_v9, %v2510_v9 }
  0xed   : > { %v1397_v16 = vsel %vm1357_vm0, %v2813_v51, 0.0  ;;  %v1432_v17 = vmul.f32 %v2813_v51, %v2813_v51  ;;  %v1469_v12 = vsel %vm1357_vm0, %v1430_v0, 0.0  ;;  %v1431_v52 = vmul.f32 %v2537_v25, %v2537_v25 }
  0xee   : > { %v1392_v38 = vadd.f32 %v1391_v42, %v1390_v40  ;;  %v1462_v62 = vadd.f32 %v1461_v50, %v1425_v43 }
  0xef   : > { %v1472_v2 = vsel %vm1357_vm0, %v1432_v17, 0.0 }
  0xf0   : > { %v1393_v19 = vadd.f32 %v1392_v38, %v2510_v9  ;;  %v1464_v46 = vadd.f32 %v1463_v56, %v1462_v62 }
  0xf2   : > { %v1395_v14 = vadd.f32 %v1394_v55, %v1393_v19  ;;  %v1465_v33 = vadd.f32 %v1464_v46, %v1427_v39  ;;  %v1494_v55 = vlaneseq }
  0xf4   : > { %v1396_v10 = vadd.f32 %v1395_v14, %v2537_v25  ;;  %v1467_v26 = vadd.f32 %v1466_v32, %v1465_v33  ;;  %v1495_v14 = vshrl.u32 %v1494_v55, 7  ;;  %v1488_v33 = vld [vmem:[%s427_s26] sm:$0x1] }
  0xf6   : > { %v1398_v7 = vadd.f32 %v1397_v16, %v1396_v10  ;;  %v1468_v36 = vadd.f32 %v1467_v26, %v1429_v47  ;;  %v1496_v32 = vsub.s32 0, %v1495_v14  ;;  %v1490_v10 = vld [vmem:[%s430_s29] sm:$0x1] }
  0xf8   : > { %v1399_v45 = vrot.slane %v1398_v7, 4  ;;  %v1470_v30 = vadd.f32 %v1469_v12, %v1468_v36 }
  0xfa   : > { %v1400_v34 = vadd.f32 %v1399_v45, %v1398_v7  ;;  %v1471_v61 = vadd.f32 %v1470_v30, %v1431_v52 }
  0xfc   : > { %v1401_v35 = vrot.slane %v1400_v34, 2  ;;  %v1473_v5 = vadd.f32 %v1472_v2, %v1471_v61 }
  0xfe   : > { %v1402_v4 = vadd.f32 %v1401_v35, %v1400_v34  ;;  %v1474_v58 = vrot.slane %v1473_v5, 4 }
 0x100   : > { %v1403_v43 = vrot.slane %v1402_v4, 1  ;;  %v1475_v40 = vadd.f32 %v1474_v58, %v1473_v5 }
 0x102   : > { %v1404_v50 = vadd.f32 %v1403_v43, %v1402_v4  ;;  %v1476_v20 = vrot.slane %v1475_v40, 2 }
 0x104   : > { %v1477_v42 = vadd.f32 %v1476_v20, %v1475_v40  ;;  %v1481_v3 = vmul.f32 0.0051020407, %v1404_v50 }
 0x106   : > { %v1478_v38 = vrot.slane %v1477_v42, 1  ;;  %v1483_v56 = vmul.f32 %v1481_v3, %v1481_v3 }
 0x108   : > { %v1479_v62 = vadd.f32 %v1478_v38, %v1477_v42 }
 0x10a   : > { %v1482_v15 = vmul.f32 0.0051020407, %v1479_v62 }
 0x10c   : > { %v1484_v39 = vsub.f32 %v1482_v15, %v1483_v56 }
 0x10e   : > { %v1485_v19 = vmax.f32 %v1484_v39, 0.0 }
 0x110   : > { %v1486_v46 = vadd.f32 1e-05, %v1485_v19 }
 0x112   : > { %1884 = vrsqrt.f32 %v1486_v46 }
 0x11c   : > { %v1885_v0 = vpop.eup %1884 }
 0x11d   : > { %v1489_v47 = vmul.f32 %v1885_v0, %v1488_v33 }
 0x11f   : > { %v1491_v26 = vmul.f32 %v1489_v47, %v1481_v3  ;;  %v2839_v16 = vrot.slane %v1489_v47, %v1496_v32 }
 0x121   : > { %v1492_v7 = vsub.f32 %v1490_v10, %v1491_v26  ;;  %v1499_v36 = vmul.f32 %v2839_v16, %v2613_v11  ;;  %v1500_v17 = vmul.f32 %v2839_v16, %v2615_v48  ;;  %v1501_v12 = vmul.f32 %v2839_v16, %v2617_v28 }
 0x122   : > { %v1502_v52 = vmul.f32 %v2839_v16, %v2619_v1  ;;  %v1503_v45 = vmul.f32 %v2839_v16, %v2624_v60  ;;  %v1504_v30 = vmul.f32 %v2839_v16, %v2659_v54  ;;  %v1505_v34 = vmul.f32 %v2839_v16, %v2626_v6 }
 0x123   : > { %v2855_v61 = vrot.slane %v1492_v7, %v1496_v32  ;;  %v1506_v11 = vmul.f32 %v2839_v16, %v2678_v37  ;;  %v1507_v48 = vmul.f32 %v2839_v16, %v2630_v29  ;;  %v1508_v28 = vmul.f32 %v2839_v16, %v2703_v13 }
 0x124   : > { %v1509_v1 = vmul.f32 %v2839_v16, %v3077_v18  ;;  %v1510_v60 = vmul.f32 %v2839_v16, %v2534_v63  ;;  %v1511_v6 = vmul.f32 %v2839_v16, %v3078_v41  ;;  %v1512_v54 = vmul.f32 %v2839_v16, %v2504_v57 }
 0x125   : > { %v1533_v37 = vadd.f32 %v2855_v61, %v1499_v36  ;;  %v1534_v2 = vadd.f32 %v2855_v61, %v1500_v17  ;;  %v1535_v29 = vadd.f32 %v2855_v61, %v1501_v12  ;;  %v1536_v13 = vadd.f32 %v2855_v61, %v1502_v52 }
 0x126   : > { %v1537_v35 = vadd.f32 %v2855_v61, %v1503_v45  ;;  %v1538_v18 = vadd.f32 %v2855_v61, %v1504_v30  ;;  %v1539_v63 = vadd.f32 %v2855_v61, %v1505_v34  ;;  %v1540_v5 = vadd.f32 %v2855_v61, %v1506_v11 }
 0x127   : > { %1561 = vst [vmem:[%s2880_s30] sm:$0xff] %v1533_v37  ;;  %1562 = vst [vmem:[%s2880_s30 + $0x8] sm:$0x3f] %v1534_v2  ;;  %v1541_v57 = vadd.f32 %v2855_v61, %v1507_v48  ;;  %v1542_v41 = vadd.f32 %v2855_v61, %v1508_v28  ;;  %v1543_v4 = vadd.f32 %v2855_v61, %v1509_v1 }
 0x128   : > { %1563 = vst [vmem:[%s2880_s30 + $0x10] sm:$0xff] %v1535_v29  ;;  %1564 = vst [vmem:[%s2880_s30 + $0x18] sm:$0x3f] %v1536_v13  ;;  %v1544_v58 = vadd.f32 %v2855_v61, %v1510_v60  ;;  %v1545_v43 = vadd.f32 %v2855_v61, %v1511_v6  ;;  %v1546_v40 = vadd.f32 %v2855_v61, %v1512_v54 }
 0x129   : > { %1565 = vst [vmem:[%s2880_s30 + $0x20] sm:$0xff] %v1537_v35  ;;  %1566 = vst [vmem:[%s2880_s30 + $0x28] sm:$0x3f] %v1538_v18  ;;  %v1513_v50 = vmul.f32 %v2839_v16, %v3069_v24  ;;  %v1514_v20 = vmul.f32 %v2839_v16, %v2636_v23  ;;  %v1515_v42 = vmul.f32 %v2839_v16, %v3079_v59 }
 0x12a   : > { %1567 = vst [vmem:[%s2880_s30 + $0x30] sm:$0xff] %v1539_v63  ;;  %1568 = vst [vmem:[%s2880_s30 + $0x38] sm:$0x3f] %v1540_v5  ;;  %v1516_v3 = vmul.f32 %v2839_v16, %v2684_v21  ;;  %v1517_v38 = vmul.f32 %v2839_v16, %v3080_v49  ;;  %v1518_v24 = vmul.f32 %v2839_v16, %v2761_v27 }
 0x12b   : > { %1569 = vst [vmem:[%s2880_s30 + $0x40] sm:$0xff] %v1541_v57  ;;  %1570 = vst [vmem:[%s2880_s30 + $0x48] sm:$0x3f] %v1542_v41  ;;  %v1547_v23 = vadd.f32 %v2855_v61, %v1513_v50  ;;  %v1548_v62 = vadd.f32 %v2855_v61, %v1514_v20  ;;  %v1519_v59 = vmul.f32 %v2839_v16, %v3081_v31 }
 0x12c   : > { %1571 = vst [vmem:[%s2880_s30 + $0x50] sm:$0xff] %v1543_v4  ;;  %1572 = vst [vmem:[%s2880_s30 + $0x58] sm:$0x3f] %v1544_v58  ;;  %v1520_v21 = vmul.f32 %v2839_v16, %v2779_v53  ;;  %v1549_v49 = vadd.f32 %v2855_v61, %v1515_v42  ;;  %v1550_v27 = vadd.f32 %v2855_v61, %v1516_v3 }
 0x12d   : > { %1573 = vst [vmem:[%s2880_s30 + $0x60] sm:$0xff] %v1545_v43  ;;  %1574 = vst [vmem:[%s2880_s30 + $0x68] sm:$0x3f] %v1546_v40  ;;  %v1551_v56 = vadd.f32 %v2855_v61, %v1517_v38  ;;  %v1552_v15 = vadd.f32 %v2855_v61, %v1518_v24  ;;  %v1553_v39 = vadd.f32 %v2855_v61, %v1519_v59 }
 0x12e   : > { %1575 = vst [vmem:[%s2880_s30 + $0x70] sm:$0xff] %v1547_v23  ;;  %1576 = vst [vmem:[%s2880_s30 + $0x78] sm:$0x3f] %v1548_v62  ;;  %v1554_v19 = vadd.f32 %v2855_v61, %v1520_v21  ;;  %v1521_v31 = vmul.f32 %v2839_v16, %v2485_v44  ;;  %v1522_v53 = vmul.f32 %v2839_v16, %v2793_v8  ;;  %1595 = sbr.rel (!%p1981_p5) target bundleno = 323 (0x143), region = 119 }
 0x12f   : > { %1577 = vst [vmem:[%s2880_s30 + $0x80] sm:$0xff] %v1549_v49  ;;  %1578 = vst [vmem:[%s2880_s30 + $0x88] sm:$0x3f] %v1550_v27  ;;  %v1523_v46 = vmul.f32 %v2839_v16, %v2510_v9  ;;  %v1524_v55 = vmul.f32 %v2839_v16, %v2805_v22  ;;  %v1525_v44 = vmul.f32 %v2839_v16, %v2537_v25  ;;  %v1679_v25 = vld [vmem:[%s2880_s30] sm:$0xff] (%p1981_p5)  ;;  %v1683_v47 = vld [vmem:[%s2880_s30 + $0x10] sm:$0xff] (%p1981_p5) }
 0x130   : > { %1579 = vst [vmem:[%s2880_s30 + $0x90] sm:$0xff] %v1551_v56  ;;  %1580 = vst [vmem:[%s2880_s30 + $0x98] sm:$0x3f] %v1552_v15  ;;  %v1526_v8 = vmul.f32 %v2839_v16, %v2813_v51  ;;  %v1555_v14 = vadd.f32 %v2855_v61, %v1521_v31  ;;  %v1556_v33 = vadd.f32 %v2855_v61, %v1522_v53  ;;  %v1681_v51 = vld [vmem:[%s2880_s30 + $0x8] sm:$0xff] (%p1981_p5)  ;;  %v1685_v10 = vld [vmem:[%s2880_s30 + $0x18] sm:$0xff] (%p1981_p5) }
 0x131   : > { %1581 = vst [vmem:[%s2880_s30 + $0xa0] sm:$0xff] %v1553_v39  ;;  %1582 = vst [vmem:[%s2880_s30 + $0xa8] sm:$0x3f] %v1554_v19  ;;  %v1557_v32 = vadd.f32 %v2855_v61, %v1523_v46  ;;  %v1558_v9 = vadd.f32 %v2855_v61, %v1524_v55  ;;  %v1559_v0 = vadd.f32 %v2855_v61, %v1525_v44  ;;  %v1687_v26 = vld [vmem:[%s2880_s30 + $0x20] sm:$0xff] (%p1981_p5)  ;;  %v1689_v16 = vld [vmem:[%s2880_s30 + $0x28] sm:$0xff] (%p1981_p5) }
 0x132   : > { %v1560_v22 = vadd.f32 %v2855_v61, %v1526_v8  ;;  %1583 = vst [vmem:[%s2880_s30 + $0xb0] sm:$0xff] %v1555_v14  ;;  %1584 = vst [vmem:[%s2880_s30 + $0xb8] sm:$0x3f] %v1556_v33  ;;  %v1691_v7 = vld [vmem:[%s2880_s30 + $0x30] sm:$0xff] (%p1981_p5)  ;;  %v1693_v36 = vld [vmem:[%s2880_s30 + $0x38] sm:$0xff] (%p1981_p5) }
 0x133   : > { %1585 = vst [vmem:[%s2880_s30 + $0xc0] sm:$0xff] %v1557_v32  ;;  %1586 = vst [vmem:[%s2880_s30 + $0xc8] sm:$0x3f] %v1558_v9  ;;  %v1695_v17 = vld [vmem:[%s2880_s30 + $0x40] sm:$0xff] (%p1981_p5)  ;;  %v1697_v12 = vld [vmem:[%s2880_s30 + $0x48] sm:$0xff] (%p1981_p5) }
 0x134   : > { %1587 = vst [vmem:[%s2880_s30 + $0xd0] sm:$0xff] %v1559_v0  ;;  %1588 = vst [vmem:[%s2880_s30 + $0xd8] sm:$0x3f] %v1560_v22  ;;  %v1699_v52 = vld [vmem:[%s2880_s30 + $0x50] sm:$0xff] (%p1981_p5)  ;;  %v1701_v45 = vld [vmem:[%s2880_s30 + $0x58] sm:$0xff] (%p1981_p5) }
 0x135   : > { %1680 = vst [vmem:[%s2967_s8] sm:$0xff] %v1679_v25  ;;  %1682 = vst [vmem:[%s2967_s8 + $0x20] sm:$0xff] %v1681_v51  ;;  %v1703_v30 = vld [vmem:[%s2880_s30 + $0x60] sm:$0xff]  ;;  %v1705_v34 = vld [vmem:[%s2880_s30 + $0x68] sm:$0xff] }
 0x136   : > { %1684 = vst [vmem:[%s2967_s8 + $0x40] sm:$0xff] %v1683_v47  ;;  %1686 = vst [vmem:[%s2967_s8 + $0x60] sm:$0xff] %v1685_v10  ;;  %v1707_v61 = vld [vmem:[%s2880_s30 + $0x70] sm:$0xff]  ;;  %v1709_v11 = vld [vmem:[%s2880_s30 + $0x78] sm:$0xff] }
 0x137   : > { %1688 = vst [vmem:[%s2967_s8 + $0x80] sm:$0xff] %v1687_v26  ;;  %1690 = vst [vmem:[%s2967_s8 + $0xa0] sm:$0xff] %v1689_v16  ;;  %v1711_v48 = vld [vmem:[%s2880_s30 + $0x80] sm:$0xff]  ;;  %v1713_v28 = vld [vmem:[%s2880_s30 + $0x88] sm:$0xff] }
 0x138   : > { %1692 = vst [vmem:[%s2967_s8 + $0xc0] sm:$0xff] %v1691_v7  ;;  %1694 = vst [vmem:[%s2967_s8 + $0xe0] sm:$0xff] %v1693_v36  ;;  %v1715_v1 = vld [vmem:[%s2880_s30 + $0x90] sm:$0xff]  ;;  %v1717_v60 = vld [vmem:[%s2880_s30 + $0x98] sm:$0xff] }
 0x139   : > { %1696 = vst [vmem:[%s2967_s8 + $0x100] sm:$0xff] %v1695_v17  ;;  %1698 = vst [vmem:[%s2967_s8 + $0x120] sm:$0xff] %v1697_v12  ;;  %v1719_v6 = vld [vmem:[%s2880_s30 + $0xa0] sm:$0xff]  ;;  %v1721_v54 = vld [vmem:[%s2880_s30 + $0xa8] sm:$0xff] }
 0x13a   : > { %1700 = vst [vmem:[%s2967_s8 + $0x140] sm:$0xff] %v1699_v52  ;;  %1702 = vst [vmem:[%s2967_s8 + $0x160] sm:$0xff] %v1701_v45  ;;  %v1723_v37 = vld [vmem:[%s2880_s30 + $0xb0] sm:$0xff]  ;;  %v1725_v2 = vld [vmem:[%s2880_s30 + $0xb8] sm:$0xff] }
 0x13b   : > { %1704 = vst [vmem:[%s2967_s8 + $0x180] sm:$0xff] %v1703_v30  ;;  %1706 = vst [vmem:[%s2967_s8 + $0x1a0] sm:$0xff] %v1705_v34  ;;  %v1727_v29 = vld [vmem:[%s2880_s30 + $0xc0] sm:$0xff]  ;;  %v1729_v13 = vld [vmem:[%s2880_s30 + $0xc8] sm:$0xff] }
 0x13c   : > { %1708 = vst [vmem:[%s2967_s8 + $0x1c0] sm:$0xff] %v1707_v61  ;;  %1710 = vst [vmem:[%s2967_s8 + $0x1e0] sm:$0xff] %v1709_v11  ;;  %v1731_v35 = vld [vmem:[%s2880_s30 + $0xd0] sm:$0xff]  ;;  %v1733_v18 = vld [vmem:[%s2880_s30 + $0xd8] sm:$0xff] }
 0x13d   : > { %1712 = vst [vmem:[%s2967_s8 + $0x200] sm:$0xff] %v1711_v48  ;;  %1714 = vst [vmem:[%s2967_s8 + $0x220] sm:$0xff] %v1713_v28 }
 0x13e   : > { %1716 = vst [vmem:[%s2967_s8 + $0x240] sm:$0xff] %v1715_v1  ;;  %1718 = vst [vmem:[%s2967_s8 + $0x260] sm:$0xff] %v1717_v60 }
 0x13f   : > { %1720 = vst [vmem:[%s2967_s8 + $0x280] sm:$0xff] %v1719_v6  ;;  %1722 = vst [vmem:[%s2967_s8 + $0x2a0] sm:$0xff] %v1721_v54 }
 0x140   : > { %1724 = vst [vmem:[%s2967_s8 + $0x2c0] sm:$0xff] %v1723_v37  ;;  %1726 = vst [vmem:[%s2967_s8 + $0x2e0] sm:$0xff] %v1725_v2 }
 0x141   : > { %1728 = vst [vmem:[%s2967_s8 + $0x300] sm:$0xff] %v1727_v29  ;;  %1730 = vst [vmem:[%s2967_s8 + $0x320] sm:$0xff] %v1729_v13 }
 0x142   : > { %1732 = vst [vmem:[%s2967_s8 + $0x340] sm:$0xff] %v1731_v35  ;;  %1734 = vst [vmem:[%s2967_s8 + $0x360] sm:$0xff] %v1733_v18 }
 0x143 PF: > { %p11_p11 = scmp.ge.s32.totalorder %s1965_s19, 6   ;;  %s3082_s15 = smov %s1914_s16 }
 0x144   : > { %s3083_s16 = smov %s1975_s22  ;;  %s3084_s17 = smov %s1965_s19 }
 0x145   :  { %13 = sbr.rel (!%p11_p11) target bundleno = 2 (0x2), region = 207 }

</bundles_post_ra>
